<compile_context>
chip_gen: v6e
topology: v6e:2x2x1
jax: 0.10.0
libtpu: 0.0.40
codegen_flags: <defaults>
</compile_context>

<pallas_src>
import jax
import jax.numpy as jnp
from jax.experimental import pallas as pl
from jax.experimental.pallas import tpu as pltpu

# Model hyper-params from the PyTorch module (n_embd = 384, hidden = 4*n_embd).
N_EMBD = 384
HIDDEN = 4 * N_EMBD
BATCH = 2
SEQ = 8
TILE_H = 768  # hidden-dim tile (multiple of 128 lanes); 512-768 amortizes per-step overhead


def ffwd_kernel(x_ref, w1_ref, b1_ref, w2_ref, b2_ref, out_ref, acc_ref):
    step = pl.program_id(0)

    @pl.when(step == 0)
    def _():
        acc_ref[...] = jnp.zeros_like(acc_ref)

    # First linear on this hidden tile: bf16 MXU operands, f32 accumulation.
    h = jnp.dot(x_ref[...], w1_ref[...], preferred_element_type=jnp.float32)
    # Bias add + ReLU stay in f32 (VPU) -- matches PyTorch semantics modulo
    # the bf16 rounding of the matmul operands.
    h = jnp.maximum(h + b1_ref[...], 0.0)
    # Second linear: partial sum over this hidden tile, accumulated in f32.
    acc_ref[...] += jnp.dot(h.astype(jnp.bfloat16), w2_ref[...],
                            preferred_element_type=jnp.float32)

    @pl.when(step == pl.num_programs(0) - 1)
    def _():
        # TODO(synk): nn.Dropout(0.2) is identity in eval/inference mode;
        # training-mode dropout (stateful PRNG mask) is intentionally omitted.
        out_ref[...] = (acc_ref[...] + b2_ref[...]).astype(out_ref.dtype)


def feed_forward(x, params):
    """x: (B, T, C) float32. params: (w1 (C,H), b1 (1,H), w2 (H,C), b2 (1,C)) float32."""
    w1, b1, w2, b2 = params
    B, T, C = x.shape
    H = w1.shape[1]
    M = B * T
    assert H % TILE_H == 0 and C % 128 == 0 and M % 8 == 0
    n_steps = H // TILE_H

    # bf16 MXU operands (weights + activations); biases stay f32.
    x2 = x.reshape(M, C).astype(jnp.bfloat16)
    w1b = w1.astype(jnp.bfloat16)
    w2b = w2.astype(jnp.bfloat16)

    cost = pl.CostEstimate(
        flops=2 * M * (C * H + H * C),
        transcendentals=0,
        bytes_accessed=(x2.size + w1b.size + w2b.size) * 2
                       + (b1.size + b2.size + M * C) * 4,
    )

    out2 = pl.pallas_call(
        ffwd_kernel,
        out_shape=jax.ShapeDtypeStruct((M, C), x.dtype),
        grid_spec=pltpu.PrefetchScalarGridSpec(
            num_scalar_prefetch=0,
            grid=(n_steps,),  # stream hidden-dim tiles; DMA overlaps MXU work
            in_specs=[
                pl.BlockSpec((M, C), lambda h: (0, 0)),       # x (resident)
                pl.BlockSpec((C, TILE_H), lambda h: (0, h)),  # W1 tile
                pl.BlockSpec((1, TILE_H), lambda h: (0, h)),  # b1 tile
                pl.BlockSpec((TILE_H, C), lambda h: (h, 0)),  # W2 tile
                pl.BlockSpec((1, C), lambda h: (0, 0)),       # b2 (resident)
            ],
            out_specs=pl.BlockSpec((M, C), lambda h: (0, 0)),
            scratch_shapes=[pltpu.VMEM((M, C), jnp.float32)],
        ),
        compiler_params=pltpu.CompilerParams(
            dimension_semantics=("arbitrary",),  # hidden axis is a reduction
        ),
        cost_estimate=cost,
    )(x2, w1b, b1, w2b, b2)
    # TODO(synk): on v7x, a leading "parallel" axis of size 2 over hidden
    # halves (+ partial-sum add) would use both TensorCores for ~2x weight BW.
    return out2.reshape(B, T, C)


def init_params(key):
    k1, k2 = jax.random.split(key)
    C, H = N_EMBD, HIDDEN
    w1 = 0.02 * jax.random.normal(k1, (C, H), jnp.float32)
    b1 = 0.01 * jnp.ones((1, H), jnp.float32)
    w2 = 0.02 * jax.random.normal(k2, (H, C), jnp.float32)
    b2 = 0.01 * jnp.ones((1, C), jnp.float32)
    return w1, b1, w2, b2


def reference_ffwd(x, params):
    """Pure-JAX f32 reference (eval-mode PyTorch semantics)."""
    w1, b1, w2, b2 = params
    return jnp.maximum(x @ w1 + b1, 0.0) @ w2 + b2


if __name__ == "__main__":
    key = jax.random.PRNGKey(0)
    kx, kp = jax.random.split(key)
    x = jax.random.normal(kx, (BATCH, SEQ, N_EMBD), jnp.float32)
    params = init_params(kp)

    out = feed_forward(x, params)
    out = jax.block_until_ready(out)

    ref = reference_ffwd(x, params)
    assert out.shape == (BATCH, SEQ, N_EMBD)
    # Tolerance loosened vs. the pure-f32 version: bf16 MXU operands are an
    # intentional numerics change (f32 accumulation retained).
    assert jnp.allclose(out, ref, atol=2e-2, rtol=2e-2), "mismatch vs reference"
    print("KERNEL_OK")
</pallas_src>

<mosaic_0001>
module attributes {stable_mosaic.version = 11 : i64} {
  func.func @ffwd_kernel(%arg0: i32, %arg1: memref<16x384xbf16, #tpu.memory_space<vmem>>, %arg2: memref<384x768xbf16, #tpu.memory_space<vmem>>, %arg3: memref<1x768xf32, #tpu.memory_space<vmem>>, %arg4: memref<768x384xbf16, #tpu.memory_space<vmem>>, %arg5: memref<1x384xf32, #tpu.memory_space<vmem>>, %arg6: memref<16x384xf32, #tpu.memory_space<vmem>>, %arg7: memref<16x384xf32, #tpu.memory_space<vmem>>) attributes {dimension_semantics = [#tpu.dimension_semantics<arbitrary>], iteration_bounds = array<i64: 2>, scalar_prefetch = 0 : i64, scratch_operands = 1 : i64, tpu.core_type = #tpu.core_type<tc>, window_params = [{pipeline_mode = #tpu.pipeline_mode<synchronous>, transform_indices = @transform_0, window_bounds = array<i64: 16, 384>}, {transform_indices = @transform_1, window_bounds = array<i64: 384, 768>}, {transform_indices = @transform_2, window_bounds = array<i64: 1, 768>}, {transform_indices = @transform_3, window_bounds = array<i64: 768, 384>}, {pipeline_mode = #tpu.pipeline_mode<synchronous>, transform_indices = @transform_4, window_bounds = array<i64: 1, 384>}, {pipeline_mode = #tpu.pipeline_mode<synchronous>, transform_indices = @transform_5, window_bounds = array<i64: 16, 384>}]} {
    %c0_i32 = arith.constant 0 : i32
    %0 = arith.cmpi eq, %arg0, %c0_i32 : i32
    %1 = arith.extui %0 : i1 to i32
    %c0_i32_0 = arith.constant 0 : i32
    %2 = arith.cmpi ne, %1, %c0_i32_0 : i32
    scf.if %2 {
      %cst_15 = arith.constant 0.000000e+00 : f32
      %20 = vector.broadcast %cst_15 : f32 to vector<16x384xf32>
      %c0_16 = arith.constant 0 : index
      %c0_17 = arith.constant 0 : index
      %21 = vector.load %arg7[%c0_16, %c0_17] : memref<16x384xf32, #tpu.memory_space<vmem>>, vector<16x384xf32>
      tpu.vector_store %arg7[%c0_16, %c0_17], %20 {strides = array<i32>} : memref<16x384xf32, #tpu.memory_space<vmem>>, vector<16x384xf32>,
    } else {
    }
    %c0 = arith.constant 0 : index
    %c0_1 = arith.constant 0 : index
    %3 = vector.load %arg1[%c0, %c0_1] : memref<16x384xbf16, #tpu.memory_space<vmem>>, vector<16x384xbf16>
    %c0_2 = arith.constant 0 : index
    %c0_3 = arith.constant 0 : index
    %4 = vector.load %arg2[%c0_2, %c0_3] : memref<384x768xbf16, #tpu.memory_space<vmem>>, vector<384x768xbf16>
    %cst = arith.constant dense<0.000000e+00> : vector<16x768xf32>
    %5 = tpu.matmul %3, %4, %cst {dimension_numbers = #tpu.dot_dimension_numbers<[1], [0], [0], [1], [0, 0, 1, 1], [], []>} : vector<16x384xbf16>, vector<384x768xbf16>, vector<16x768xf32> -> vector<16x768xf32>
    %c0_4 = arith.constant 0 : index
    %c0_5 = arith.constant 0 : index
    %6 = vector.load %arg3[%c0_4, %c0_5] : memref<1x768xf32, #tpu.memory_space<vmem>>, vector<1x768xf32>
    %7 = vector.broadcast %6 : vector<1x768xf32> to vector<16x768xf32>
    %8 = arith.addf %5, %7 : vector<16x768xf32>
    %cst_6 = arith.constant 0.000000e+00 : f32
    %9 = vector.broadcast %cst_6 : f32 to vector<16x768xf32>
    %10 = arith.maximumf %8, %9 : vector<16x768xf32>
    %c0_7 = arith.constant 0 : index
    %c0_8 = arith.constant 0 : index
    %11 = vector.load %arg7[%c0_7, %c0_8] : memref<16x384xf32, #tpu.memory_space<vmem>>, vector<16x384xf32>
    %12 = arith.truncf %10 : vector<16x768xf32> to vector<16x768xbf16>
    %c0_9 = arith.constant 0 : index
    %c0_10 = arith.constant 0 : index
    %13 = vector.load %arg4[%c0_9, %c0_10] : memref<768x384xbf16, #tpu.memory_space<vmem>>, vector<768x384xbf16>
    %cst_11 = arith.constant dense<0.000000e+00> : vector<16x384xf32>
    %14 = tpu.matmul %12, %13, %cst_11 {dimension_numbers = #tpu.dot_dimension_numbers<[1], [0], [0], [1], [0, 0, 1, 1], [], []>} : vector<16x768xbf16>, vector<768x384xbf16>, vector<16x384xf32> -> vector<16x384xf32>
    %15 = arith.addf %11, %14 : vector<16x384xf32>
    %c0_12 = arith.constant 0 : index
    %c0_13 = arith.constant 0 : index
    %16 = vector.load %arg7[%c0_12, %c0_13] : memref<16x384xf32, #tpu.memory_space<vmem>>, vector<16x384xf32>
    tpu.vector_store %arg7[%c0_12, %c0_13], %15 {strides = array<i32>} : memref<16x384xf32, #tpu.memory_space<vmem>>, vector<16x384xf32>,
    %c1_i32 = arith.constant 1 : i32
    %17 = arith.cmpi eq, %arg0, %c1_i32 : i32
    %18 = arith.extui %17 : i1 to i32
    %c0_i32_14 = arith.constant 0 : i32
    %19 = arith.cmpi ne, %18, %c0_i32_14 : i32
    scf.if %19 {
      %c0_15 = arith.constant 0 : index
      %c0_16 = arith.constant 0 : index
      %20 = vector.load %arg7[%c0_15, %c0_16] : memref<16x384xf32, #tpu.memory_space<vmem>>, vector<16x384xf32>
      %c0_17 = arith.constant 0 : index
      %c0_18 = arith.constant 0 : index
      %21 = vector.load %arg5[%c0_17, %c0_18] : memref<1x384xf32, #tpu.memory_space<vmem>>, vector<1x384xf32>
      %22 = vector.broadcast %21 : vector<1x384xf32> to vector<16x384xf32>
      %23 = arith.addf %20, %22 : vector<16x384xf32>
      %c0_19 = arith.constant 0 : index
      %c0_20 = arith.constant 0 : index
      %24 = vector.load %arg6[%c0_19, %c0_20] : memref<16x384xf32, #tpu.memory_space<vmem>>, vector<16x384xf32>
      tpu.vector_store %arg6[%c0_19, %c0_20], %23 {strides = array<i32>} : memref<16x384xf32, #tpu.memory_space<vmem>>, vector<16x384xf32>,
    } else {
    }
    return
  }
  func.func @transform_0(%arg0: i32) -> (i32, i32) {
    %c0_i32 = arith.constant 0 : i32
    %c0_i32_0 = arith.constant 0 : i32
    %c0_i32_1 = arith.constant 0 : i32
    return %c0_i32, %c0_i32_0 : i32, i32
  }
  func.func @transform_1(%arg0: i32) -> (i32, i32) {
    %c0_i32 = arith.constant 0 : i32
    %c0_i32_0 = arith.constant 0 : i32
    return %c0_i32, %arg0 : i32, i32
  }
  func.func @transform_2(%arg0: i32) -> (i32, i32) {
    %c0_i32 = arith.constant 0 : i32
    %c0_i32_0 = arith.constant 0 : i32
    return %c0_i32, %arg0 : i32, i32
  }
  func.func @transform_3(%arg0: i32) -> (i32, i32) {
    %c0_i32 = arith.constant 0 : i32
    %c0_i32_0 = arith.constant 0 : i32
    return %arg0, %c0_i32 : i32, i32
  }
  func.func @transform_4(%arg0: i32) -> (i32, i32) {
    %c0_i32 = arith.constant 0 : i32
    %c0_i32_0 = arith.constant 0 : i32
    %c0_i32_1 = arith.constant 0 : i32
    return %c0_i32, %c0_i32_0 : i32, i32
  }
  func.func @transform_5(%arg0: i32) -> (i32, i32) {
    %c0_i32 = arith.constant 0 : i32
    %c0_i32_0 = arith.constant 0 : i32
    %c0_i32_1 = arith.constant 0 : i32
    return %c0_i32, %c0_i32_0 : i32, i32
  }
}

</mosaic_0001>

<bundles_post_ra>
// kernel: tpu_custom_call.1
= control target key start
LH: loop header
LB: loop body
LE: loop exit
PB: predicated region body
PF: predicated region fallthrough
CT: control target
= control target key end

     0   :  { %s4670_s0 = inlined_call_operand.hbm [shape: bf16[16,384], index: 0, kind: input, shape index: {}]   ;;  %s4671_s1 = inlined_call_operand.hbm [shape: bf16[384,1536], index: 1, kind: input, shape index: {}]   ;;  %s4672_s2 = inlined_call_operand.hbm [shape: f32[1,1536], index: 2, kind: input, shape index: {}]   ;;  %s4673_s3 = inlined_call_operand.hbm [shape: bf16[1536,384], index: 3, kind: input, shape index: {}]   ;;  %s4674_s4 = inlined_call_operand.hbm [shape: f32[1,384], index: 4, kind: input, shape index: {}]   ;;  %s4675_s5 = inlined_call_operand.hbm [shape: f32[16,384], index: 5, kind: output, shape index: {}]  }
   0x1   :  { %4683 = sst [smem:[#allocation19_spill]] %s4671_s1 }
   0x2   :  { %4684 = sst [smem:[#allocation20_spill]] %s4674_s4 }
   0x3   :  { %10 = vsyncpa [#allocation4], 0 }
   0x4   :  { %11 = vsyncpa [#allocation7], 0 }
   0x5   :  { %13 = vsyncpa [#allocation7 + $0x1], 0 }
   0x6   :  { %14 = vsyncpa [#allocation10], 0 }
   0x7   :  { %16 = vsyncpa [#allocation10 + $0x1], 0 }
   0x8   :  { %17 = vsyncpa [#allocation5], 0  ;;  %s4070_s18 = smov 0   ;;  %s4072_s19 = smov 0  }
   0x9   :  { %s4074_s20 = smov 0   ;;  %s4076_s21 = smov 0  }
   0xa LB: > { %s4089_s22 = sadd.s32 4294967295, %s4023_s21   ;;  %s4092_s23 = sadd.s32 1, %s4023_s21   ;;  %s4023_s21 = sphi %s4076_s21, %s4708_s21   ;;  %s4019_s20 = sphi %s4074_s20, %s4707_s20   ;;  %s4015_s19 = sphi %s4072_s19, %s4706_s19   ;;  %s4011_s18 = sphi %s4070_s18, %s4705_s18  }
   0xb   : > { %s48_s24 = ssub.s32 %s4023_s21, %s4092_s23  ;;  %s51_s25 = sadd.s32 1, %s4019_s20 }
   0xc   : > { %p49_p0 = scmp.eq.s32.totalorder %s48_s24, 0  ;;  %p58_p1 = scmp.ne.s32.totalorder %s4019_s20, %s4015_s19 }
   0xd   : > { %p59_p2 = scmp.eq.s32.totalorder %s4023_s21, 0  ;;  %p64_p3 = scmp.ne.s32.totalorder %s4015_s19, %s4011_s18 }
   0xe   : > { %s4102_s26 = scalar_select %p49_p0, %s4019_s20, %s51_s25  }
   0xf   : > { %p4104_p4 = por %p59_p2, %p58_p1  ;;  %p4676_p5 = scmp.eq.s32.totalorder %s4089_s22, 0 }
  0x10   : > { %4685 = sst [smem:[#allocation18_spill]] %s4102_s26  ;;  %p2933_p6 = scmp.ge.s32.totalorder %s4023_s21, 1 }
  0x11   : > { %p169_p7 = scmp.lt.s32.totalorder %s4023_s21, 3  ;;  %p4113_p8 = por %p4676_p5, %p64_p3 }
  0x12   : > { %s4025_s30 = smov [#allocation11]   ;;  %p3351_p12 = scmp.lt.s32.totalorder %s4023_s21, 2 }
  0x13   : > { %s4687_s28 = scalar_select %p4113_p8, 1, 0 }
  0x14   : > { %p4118_p10 = pnand %p2933_p6, %p169_p7  ;;  %s195_s6 = sshll.u32 %s4025_s30, 4  ;;  %s196_s6 = int_to_ptr.vmem [resolvable:$true] %s195_s6 }
  0x15   : > { %s4682_s7 = sand.u32 1, %s4023_s21   ;;  %p4134_p0 = pnand %p3351_p12, %p4104_p4 }
  0x16   : > { %s4688_s29 = scalar_select %p4118_p10, 1, 0 }
  0x17   : > { %p3332_p11 = pneg %p4118_p10  ;;  %s208_s10 = sand.u32 1, %s4019_s20  }
  0x18   : > { %s4141_s11 = smul.u32 1152, %s208_s10  ;;  %s3824_s12 = scalar_lea.vmem %s196_s6, 48 }
  0x19   : > { %p4128_p13 = pnand %p3332_p11, %p4676_p5  ;;  %p3825_p2 = scmp.ne.s32.totalorder %s196_s6, %s3824_s12 }
  0x1a   : > { %s3831_s13 = scalar_lea.vmem %s196_s6, 64  ;;  %p3832_p7 = scmp.lt.s32.totalorder %s196_s6, %s196_s6 }
  0x1b   : > { %s4689_s8 = scalar_select %p4128_p13, 1, 0 }
  0x1c   : > { %p4677_p1 = pneg %p4128_p13  ;;  %p3833_p11 = scmp.lt.s32.totalorder %s3831_s13, %s3824_s12 }
  0x1e   : > { %p3827_p3 = pnand %p3825_p2, %p4677_p1  ;;  %p3834_p9 = por %p3833_p11, %p3832_p7 }
  0x20   : > { %p3828_p6 = pneg %p3827_p3 }
  0x22   : > { %p3835_p4 = pnand %p3834_p9, %p3828_p6 }
  0x24   : > { %3838 = shalt.err (!%p3835_p4)
}
  0x25   : > { %s4691_s4 = sld [smem:[#allocation20_spill]]  ;;  %s3240_s16 = smul.u32 384, %s4023_s21 }
  0x26   : > { %s210_s17 = scalar_lea.vmem [#allocation6], %s4141_s11  ;;  %s4692_s1 = sld [smem:[#allocation19_spill]] }
  0x27   : > { %s217_s18 = sshll.u32 %s210_s17, 4  ;;  %s4164_s30 = scalar_lea.sflag [#allocation7], %s4682_s7  ;;  %s4155_s18 = int_to_ptr.vmem [resolvable:$true] %s217_s18 }
  0x28   : > { %p4170_p12 = pneg %p4134_p0 }
  0x2b   : > { %3338 = dma.hbm_to_vmem [thread:$0]  (!%p4128_p13), %s4691_s4, 48, %s196_s6, [#allocation10]  }
  0x2c   : > { %s4160_s27 = scalar_lea.hbm %s4692_s1, %s3240_s16  ;;  %s3844_s15 = scalar_lea.hbm %s4692_s1, 36864 }
  0x2d   : > { %s3839_s12 = scalar_lea.hbm %s4160_s27, 18432  ;;  %p3845_p6 = scmp.lt.s32.totalorder %s4160_s27, %s4692_s1 }
  0x2e   : > { %p3840_p9 = scmp.ne.s32.totalorder %s4160_s27, %s3839_s12  ;;  %p3846_p7 = scmp.lt.s32.totalorder %s3844_s15, %s3839_s12 }
  0x30   : > { %p3842_p2 = pnand %p4170_p12, %p3840_p9  ;;  %p3847_p11 = por %p3846_p7, %p3845_p6 }
  0x32   : > { %p3843_p3 = pneg %p3842_p2 }
  0x34   : > { %p3848_p4 = pnand %p3847_p11, %p3843_p3 }
  0x36   : > { %3851 = shalt.err (!%p3848_p4)
}
  0x37   : > { %s3852_s24 = scalar_lea.vmem %s4155_s18, 18432  ;;  %s4026_s25 = smov [#allocation6]  }
  0x38   : > { %p3853_p5 = scmp.ne.s32.totalorder %s4155_s18, %s3852_s24  ;;  %s3857_s13 = sshll.u32 %s4026_s25, 4  ;;  %s3858_s13 = int_to_ptr.vmem [resolvable:$false] %s3857_s13 }
  0x39   : > { %s3859_s14 = scalar_lea.vmem %s3858_s13, 36864  ;;  %p3860_p1 = scmp.lt.s32.totalorder %s4155_s18, %s3858_s13 }
  0x3a   : > { %p3855_p9 = pnand %p3853_p5, %p4170_p12  ;;  %p3861_p8 = scmp.lt.s32.totalorder %s3859_s14, %s3852_s24 }
  0x3c   : > { %p3856_p2 = pneg %p3855_p9  ;;  %p3862_p10 = por %p3861_p8, %p3860_p1 }
  0x3e   : > { %p3863_p13 = pnand %p3862_p10, %p3856_p2 }
  0x40   : > { %3866 = shalt.err (!%p3863_p13)
}
  0x41   : > { %s4027_s12 = smov 768   ;;  %s4028_s15 = smov 384  }
  0x42   : > { %s4029_s16 = smov 24   ;;  %s4030_s17 = smov [#allocation3]  }
  0x43   : > { %3342 = dma.hbm_to_vmem [thread:$0]  (!%p4134_p0), %s4160_s27, 18432, %s4155_s18, %s4164_s30, %s4027_s12, %s4028_s15, %s4029_s16  }
  0x44   : > { %s181_s7 = sshll.u32 %s4030_s17, 4  ;;  %p4694_p3 = scmp.ne.s32.totalorder %s4689_s8, 0  ;;  %s182_s7 = int_to_ptr.vmem [resolvable:$true] %s181_s7 }
  0x45   : > { %s3878_s25 = scalar_lea.vmem %s182_s7, 384  ;;  %p3886_p13 = scmp.lt.s32.totalorder %s182_s7, %s182_s7 }
  0x46   : > { %p3879_p5 = scmp.ne.s32.totalorder %s182_s7, %s3878_s25  ;;  %p4695_p6 = pneg %p4694_p3 }
  0x47   : > { %p3887_p1 = scmp.lt.s32.totalorder %s3878_s25, %s3878_s25 }
  0x48   : > { %p3881_p8 = pnand %p3879_p5, %p4695_p6 }
  0x49   : > { %p3888_p7 = por %p3887_p1, %p3886_p13 }
  0x4a   : > { %p3882_p10 = pneg %p3881_p8 }
  0x4c   : > { %p3889_p11 = pnand %p3888_p7, %p3882_p10 }
  0x4e   : > { %3892 = shalt.err (!%p3889_p11)
}
  0x4f   : > { %s4031_s24 = smov 192   ;;  %s4032_s18 = smov 12  }
  0x50   : > { %3335 = dma.hbm_to_vmem [thread:$0]  (!%p4694_p3), %s4670_s0, 384, %s182_s7, [#allocation4], %s4031_s24, %s4031_s24, %s4032_s18  }
  0x51   : > { %s3309_s14 = smul.u32 6, %s208_s10 }
  0x52   : > { %s3241_s12 = smul.u32 96, %s4023_s21 }
  0x53   : > { %s3352_s15 = smul.u32 18432, %s4023_s21  ;;  %s231_s8 = scalar_lea.vmem [#allocation8], %s3309_s14 }
  0x54   : > { %s4211_s25 = scalar_lea.hbm %s4672_s2, %s3241_s12  ;;  %s239_s1 = sshll.u32 %s231_s8, 4  ;;  %s240_s1 = int_to_ptr.vmem [resolvable:$true] %s239_s1 }
  0x55   : > { %s4216_s27 = scalar_lea.hbm %s4673_s3, %s3352_s15  ;;  %s3893_s7 = scalar_lea.hbm %s4211_s25, 96 }
  0x56   : > { %p3894_p4 = scmp.ne.s32.totalorder %s4211_s25, %s3893_s7  ;;  %s3898_s12 = scalar_lea.hbm %s4672_s2, 192 }
  0x57   : > { %p3899_p5 = scmp.lt.s32.totalorder %s4211_s25, %s4672_s2  ;;  %p3900_p3 = scmp.lt.s32.totalorder %s3898_s12, %s3893_s7 }
  0x58   : > { %p3896_p9 = pnand %p3894_p4, %p4170_p12 }
  0x59   : > { %p3901_p6 = por %p3900_p3, %p3899_p5 }
  0x5a   : > { %p3897_p2 = pneg %p3896_p9 }
  0x5c   : > { %p3902_p8 = pnand %p3901_p6, %p3897_p2 }
  0x5e   : > { %3905 = shalt.err (!%p3902_p8)
}
  0x5f   : > { %s3906_s4 = scalar_lea.vmem %s240_s1, 96  ;;  %s4033_s26 = smov [#allocation8]  }
  0x60   : > { %p3907_p10 = scmp.ne.s32.totalorder %s240_s1, %s3906_s4  ;;  %s3911_s14 = sshll.u32 %s4033_s26, 4  ;;  %s3912_s14 = int_to_ptr.vmem [resolvable:$false] %s3911_s14 }
  0x61   : > { %s3913_s15 = scalar_lea.vmem %s3912_s14, 192  ;;  %p3914_p7 = scmp.lt.s32.totalorder %s240_s1, %s3912_s14 }
  0x62   : > { %p3909_p13 = pnand %p3907_p10, %p4170_p12  ;;  %p3915_p11 = scmp.lt.s32.totalorder %s3913_s15, %s3906_s4 }
  0x64   : > { %p3910_p1 = pneg %p3909_p13  ;;  %p3916_p4 = por %p3915_p11, %p3914_p7 }
  0x66   : > { %p3917_p9 = pnand %p3916_p4, %p3910_p1 }
  0x68   : > { %3920 = shalt.err (!%p3917_p9)
}
  0x69   : > { %3345 = dma.hbm_to_vmem [thread:$0]  (!%p4134_p0), %s4211_s25, 96, %s240_s1, %s4164_s30  }
  0x6a   : > { %s250_s8 = scalar_lea.vmem [#allocation9], %s4141_s11  ;;  %s4696_s10 = sand.u32 1, %s4023_s21  }
  0x6b   : > { %s258_s7 = sshll.u32 %s250_s8, 4  ;;  %s247_s13 = scalar_lea.sflag [#allocation10], %s4696_s10  ;;  %s4236_s7 = int_to_ptr.vmem [resolvable:$true] %s258_s7 }
  0x6c   : > { %s3921_s12 = scalar_lea.hbm %s4216_s27, 18432  ;;  %s3926_s4 = scalar_lea.hbm %s4673_s3, 36864 }
  0x6d   : > { %p3922_p2 = scmp.ne.s32.totalorder %s4216_s27, %s3921_s12  ;;  %p3927_p6 = scmp.lt.s32.totalorder %s4216_s27, %s4673_s3 }
  0x6e   : > { %p3928_p8 = scmp.lt.s32.totalorder %s3926_s4, %s3921_s12 }
  0x6f   : > { %p3924_p5 = pnand %p3922_p2, %p4170_p12 }
  0x70   : > { %p3929_p10 = por %p3928_p8, %p3927_p6 }
  0x71   : > { %p3925_p3 = pneg %p3924_p5 }
  0x73   : > { %p3930_p13 = pnand %p3929_p10, %p3925_p3 }
  0x75   : > { %3933 = shalt.err (!%p3930_p13)
}
  0x76   : > { %s3934_s1 = scalar_lea.vmem %s4236_s7, 18432  ;;  %s4034_s21 = smov [#allocation9]  }
  0x77   : > { %p3935_p1 = scmp.ne.s32.totalorder %s4236_s7, %s3934_s1  ;;  %s3939_s11 = sshll.u32 %s4034_s21, 4  ;;  %s3940_s11 = int_to_ptr.vmem [resolvable:$false] %s3939_s11 }
  0x78   : > { %s3941_s30 = scalar_lea.vmem %s3940_s11, 36864  ;;  %p3942_p4 = scmp.lt.s32.totalorder %s4236_s7, %s3940_s11 }
  0x79   : > { %p3937_p7 = pnand %p3935_p1, %p4170_p12  ;;  %p3943_p9 = scmp.lt.s32.totalorder %s3941_s30, %s3934_s1 }
  0x7b   : > { %p3938_p11 = pneg %p3937_p7  ;;  %p3944_p2 = por %p3943_p9, %p3942_p4 }
  0x7d   : > { %p3945_p5 = pnand %p3944_p2, %p3938_p11 }
  0x7f   : > { %3948 = shalt.err (!%p3945_p5)
}
  0x80   : > { %3348 = dma.hbm_to_vmem [thread:$0]  (!%p4134_p0), %s4216_s27, 18432, %s4236_s7, %s247_s13, %s4031_s24, %s4031_s24, %s4032_s18  }
  0x81   : > { %p4697_p12 = scmp.ne.s32.totalorder %s4688_s29, 0 }
  0x82   : > { %p4698_p3 = scmp.eq.s32.totalorder (!%p4697_p12), %s4089_s22, 0 }
  0x83   : > { %270 = sbr.rel (%p4697_p12) target bundleno = 793 (0x319), region = 40 }
  0x88   : > { %3990 = dma.done.wait (%p4698_p3), [#allocation4], 384   ;;  %p4699_p6 = pmov %p4698_p3 }
  0x89   : > { %s276_s6 = sand.u32 1, %s4089_s22   ;;  %s278_s9 = sand.u32 1, %s4015_s19  }
  0x8a   : > { %3992 = vsyncadd (%p4699_p6), [#allocation4], 4294966912  ;;  %s3312_s25 = smul.u32 1152, %s278_s9  ;;  %s277_s15 = scalar_lea.sflag [#allocation7], %s276_s6 }
  0x8b   : > { %p4700_p8 = scmp.ne.s32.totalorder %s4687_s28, 0 }
  0x8c   : > { %s4271_s8 = scalar_lea.vmem [#allocation6], %s3312_s25 }
  0x8d   : > { %3994 = dma.done.wait (%p4700_p8), %s277_s15, 18528  }
  0x8e   : > { %3996 = vsyncadd (%p4700_p8), %s277_s15, 4294948768  ;;  %s4277_s29 = smul.u32 6, %s278_s9  ;;  %s295_s18 = scalar_lea.sflag [#allocation10], %s276_s6 }
  0x8f   : > { %s4280_s27 = scalar_lea.vmem [#allocation9], %s3312_s25 }
  0x90   : > { %s289_s24 = scalar_lea.vmem [#allocation8], %s4277_s29 }
  0x91   : > { %3998 = dma.done.wait (%p4700_p8), %s295_s18, 18432  }
  0x92   : > { %4000 = vsyncadd (%p4700_p8), %s295_s18, 4294948864  ;;  %p4701_p0 = pmov %p4698_p3 }
  0x94   : > { %4002 = dma.done.wait (%p4701_p0), [#allocation10], 48   ;;  %p4702_p10 = pmov %p4701_p0 }
  0x95   : > { %p4703_p13 = scmp.ne.s32.totalorder %s4089_s22, 0 }
  0x96   : > { %4004 = vsyncadd (%p4702_p10), [#allocation10], 4294967248 }
  0x97   : > { %341 = sbr.rel (%p4703_p13) target bundleno = 160 (0xa0), region = 64 }
  0x9c   : > { %v4035_v0 = vmov 0.0  }
  0x9d   : > { %342 = vst [vmem:[#allocation2 + $0x28] sm:$0xff] %v4035_v0  ;;  %343 = vst [vmem:[#allocation2 + $0x10] sm:$0xff] %v4035_v0 }
  0x9e   : > { %344 = vst [vmem:[#allocation2 + $0x8] sm:$0xff] %v4035_v0  ;;  %345 = vst [vmem:[#allocation2] sm:$0xff] %v4035_v0 }
  0x9f   : > { %346 = vst [vmem:[#allocation2 + $0x18] sm:$0xff] %v4035_v0  ;;  %347 = vst [vmem:[#allocation2 + $0x20] sm:$0xff] %v4035_v0 }
  0xa0 PF: > { %v3401_v1 = vld [vmem:[%s4271_s8 + $0x154] ss:$24 sps:$4 sm:$0xff]   ;;  %v4036_v3 = vmov 0   ;;  %v3405_v4 = vld [vmem:[%s4271_s8 + $0x150] ss:$24 sps:$4 sm:$0xff]   ;;  %p3235_p1 = scmp.ne.s32.totalorder %s4089_s22, 1 }
  0xa1   : > { %v3403_v2 = vld [vmem:[%s4271_s8 + $0x454] ss:$24 sps:$4 sm:$0xff]   ;;  %1339 = vmatprep.mubr.bf16.mxu1 %v4036_v3  ;;  %1264 = vmatprep.subr.bf16.mxu0 %v3401_v1  ;;  %v3406_v5 = vld [vmem:[%s4271_s8 + $0x450] ss:$24 sps:$4 sm:$0xff]   ;;  %v3407_v6 = vld [vmem:[%s4271_s8 + $0x124] ss:$24 sps:$4 sm:$0xff]  }
  0xa2   : > { %1307 = vmatprep.subr.bf16.mxu1 %v3403_v2  ;;  %1265 = vmatpush1.bf16.msra.mxu0 %v3405_v4  ;;  %v3409_v7 = vld [vmem:[%s4271_s8 + $0x424] ss:$24 sps:$4 sm:$0xff]   ;;  %v3411_v8 = vld [vmem:[%s4271_s8 + $0x120] ss:$24 sps:$4 sm:$0xff]   ;;  %v3413_v10 = vld [vmem:[%s4271_s8 + $0xf4] ss:$24 sps:$4 sm:$0xff]  }
  0xa3   : > { %1308 = vmatpush1.bf16.msra.mxu1 %v3406_v5  ;;  %1266 = vmatprep.subr.bf16.mxu0 %v3407_v6  ;;  %v3412_v9 = vld [vmem:[%s4271_s8 + $0x420] ss:$24 sps:$4 sm:$0xff]   ;;  %v3415_v11 = vld [vmem:[%s4271_s8 + $0x3f4] ss:$24 sps:$4 sm:$0xff]   ;;  %v3417_v12 = vld [vmem:[%s4271_s8 + $0xf0] ss:$24 sps:$4 sm:$0xff]  }
  0xa4   : > { %1309 = vmatprep.subr.bf16.mxu1 %v3409_v7  ;;  %v3418_v13 = vld [vmem:[%s4271_s8 + $0x3f0] ss:$24 sps:$4 sm:$0xff]   ;;  %v3419_v14 = vld [vmem:[%s4271_s8 + $0xc4] ss:$24 sps:$4 sm:$0xff]   ;;  %v3423_v16 = vld [vmem:[%s4271_s8 + $0xc0] ss:$24 sps:$4 sm:$0xff]  }
  0xa5   : > { %v3421_v15 = vld [vmem:[%s4271_s8 + $0x3c4] ss:$24 sps:$4 sm:$0xff]   ;;  %v3424_v17 = vld [vmem:[%s4271_s8 + $0x3c0] ss:$24 sps:$4 sm:$0xff]   ;;  %v3425_v18 = vld [vmem:[%s4271_s8 + $0x94] ss:$24 sps:$4 sm:$0xff]  }
  0xa6   : > { %1267 = vmatpush1.bf16.msra.mxu0 %v3411_v8  ;;  %v3427_v19 = vld [vmem:[%s4271_s8 + $0x394] ss:$24 sps:$4 sm:$0xff]   ;;  %v3429_v20 = vld [vmem:[%s4271_s8 + $0x90] ss:$24 sps:$4 sm:$0xff]   ;;  %v3431_v22 = vld [vmem:[%s4271_s8 + $0x64] ss:$24 sps:$4 sm:$0xff]  }
  0xa7   : > { %1310 = vmatpush1.bf16.msra.mxu1 %v3412_v9  ;;  %1268 = vmatprep.subr.bf16.mxu0 %v3413_v10  ;;  %v3430_v21 = vld [vmem:[%s4271_s8 + $0x390] ss:$24 sps:$4 sm:$0xff]   ;;  %v3433_v23 = vld [vmem:[%s4271_s8 + $0x364] ss:$24 sps:$4 sm:$0xff]   ;;  %v3435_v24 = vld [vmem:[%s4271_s8 + $0x60] ss:$24 sps:$4 sm:$0xff]  }
  0xa8   : > { %1311 = vmatprep.subr.bf16.mxu1 %v3415_v11  ;;  %v3436_v25 = vld [vmem:[%s4271_s8 + $0x360] ss:$24 sps:$4 sm:$0xff]   ;;  %v3437_v26 = vld [vmem:[%s4271_s8 + $0x34] ss:$24 sps:$4 sm:$0xff]   ;;  %v3441_v28 = vld [vmem:[%s4271_s8 + $0x30] ss:$24 sps:$4 sm:$0xff]  }
  0xa9   : > { %v3439_v27 = vld [vmem:[%s4271_s8 + $0x334] ss:$24 sps:$4 sm:$0xff]   ;;  %v3442_v29 = vld [vmem:[%s4271_s8 + $0x330] ss:$24 sps:$4 sm:$0xff]   ;;  %v3443_v30 = vld [vmem:[%s4271_s8 + $0x4] ss:$24 sps:$4 sm:$0xff]  }
  0xaa   : > { %1269 = vmatpush1.bf16.msra.mxu0 %v3417_v12  ;;  %v3445_v31 = vld [vmem:[%s4271_s8 + $0x304] ss:$24 sps:$4 sm:$0xff]   ;;  %v3447_v32 = vld [vmem:[%s4271_s8] ss:$24 sps:$4 sm:$0xff]   ;;  %v3449_v34 = vld [vmem:[%s4271_s8 + $0x2d4] ss:$24 sps:$4 sm:$0xff]  }
  0xab   : > { %1312 = vmatpush1.bf16.msra.mxu1 %v3418_v13  ;;  %1270 = vmatprep.subr.bf16.mxu0 %v3419_v14  ;;  %v3448_v33 = vld [vmem:[%s4271_s8 + $0x300] ss:$24 sps:$4 sm:$0xff]   ;;  %v3453_v35 = vld [vmem:[%s4271_s8 + $0x15c] ss:$24 sps:$4 sm:$0xff]   ;;  %v3454_v38 = vld [vmem:[%s4271_s8 + $0x2d0] ss:$24 sps:$4 sm:$0xff]  }
  0xac   : > { %1313 = vmatprep.subr.bf16.mxu1 %v3421_v15  ;;  %v4327_v36 = vld [vmem:[#allocation3 + $0x8] ss:$12 sps:$4 sm:$0xff]   ;;  %v3460_v40 = vld [vmem:[%s4271_s8 + $0x12c] ss:$24 sps:$4 sm:$0xff]   ;;  %v3458_v41 = vld [vmem:[%s4271_s8 + $0x128] ss:$24 sps:$4 sm:$0xff]  }
  0xad   : > { %v3451_v37 = vld [vmem:[%s4271_s8 + $0x158] ss:$24 sps:$4 sm:$0xff]   ;;  %v3456_v39 = vld [vmem:[%s4271_s8 + $0x2a4] ss:$24 sps:$4 sm:$0xff]   ;;  %v3462_v43 = vld [vmem:[%s4271_s8 + $0x274] ss:$24 sps:$4 sm:$0xff]  }
  0xae   : > { %1271 = vmatpush1.bf16.msra.mxu0 %v3423_v16  ;;  %v3461_v42 = vld [vmem:[%s4271_s8 + $0x2a0] ss:$24 sps:$4 sm:$0xff]   ;;  %v3466_v44 = vld [vmem:[%s4271_s8 + $0xfc] ss:$24 sps:$4 sm:$0xff]   ;;  %v3467_v46 = vld [vmem:[%s4271_s8 + $0x270] ss:$24 sps:$4 sm:$0xff]  }
  0xaf   : > { %1314 = vmatpush1.bf16.msra.mxu1 %v3424_v17  ;;  %1272 = vmatprep.subr.bf16.mxu0 %v3425_v18  ;;  %v3464_v45 = vld [vmem:[%s4271_s8 + $0xf8] ss:$24 sps:$4 sm:$0xff]   ;;  %v3468_v47 = vld [vmem:[%s4271_s8 + $0x244] ss:$24 sps:$4 sm:$0xff]   ;;  %v3470_v49 = vld [vmem:[%s4271_s8 + $0xc8] ss:$24 sps:$4 sm:$0xff]  }
  0xb0   : > { %1315 = vmatprep.subr.bf16.mxu1 %v3427_v19  ;;  %v3472_v48 = vld [vmem:[%s4271_s8 + $0xcc] ss:$24 sps:$4 sm:$0xff]   ;;  %v3473_v50 = vld [vmem:[%s4271_s8 + $0x240] ss:$24 sps:$4 sm:$0xff]   ;;  %v3478_v53 = vld [vmem:[%s4271_s8 + $0x9c] ss:$24 sps:$4 sm:$0xff]  }
  0xb1   : > { %v3474_v51 = vld [vmem:[%s4271_s8 + $0x214] ss:$24 sps:$4 sm:$0xff]   ;;  %v3476_v54 = vld [vmem:[%s4271_s8 + $0x98] ss:$24 sps:$4 sm:$0xff]   ;;  %v3480_v56 = vld [vmem:[%s4271_s8 + $0x1e4] ss:$24 sps:$4 sm:$0xff]  }
  0xb2   : > { %1273 = vmatpush1.bf16.msra.mxu0 %v3429_v20  ;;  %v4345_v52 = vld [vmem:[#allocation3 + $0x4] ss:$12 sps:$4 sm:$0xff]   ;;  %v3479_v55 = vld [vmem:[%s4271_s8 + $0x210] ss:$24 sps:$4 sm:$0xff]   ;;  %v3490_v61 = vld [vmem:[%s4271_s8 + $0x3c] ss:$24 sps:$4 sm:$0xff]  }
  0xb3   : > { %1316 = vmatpush1.bf16.msra.mxu1 %v3430_v21  ;;  %1274 = vmatprep.subr.bf16.mxu0 %v3431_v22  ;;  %v3484_v57 = vld [vmem:[%s4271_s8 + $0x6c] ss:$24 sps:$4 sm:$0xff]   ;;  %v3482_v58 = vld [vmem:[%s4271_s8 + $0x68] ss:$24 sps:$4 sm:$0xff]   ;;  %v3488_v62 = vld [vmem:[%s4271_s8 + $0x38] ss:$24 sps:$4 sm:$0xff]  }
  0xb4   : > { %1317 = vmatprep.subr.bf16.mxu1 %v3433_v23  ;;  %1296 = vmatprep.mubr.bf16.mxu0 %v4345_v52  ;;  %v3485_v59 = vld [vmem:[%s4271_s8 + $0x1e0] ss:$24 sps:$4 sm:$0xff]   ;;  %v3486_v60 = vld [vmem:[%s4271_s8 + $0x1b4] ss:$24 sps:$4 sm:$0xff]   ;;  %v3491_v63 = vld [vmem:[%s4271_s8 + $0x1b0] ss:$24 sps:$4 sm:$0xff]  }
  0xb5   : > { %v3492_v0 = vld [vmem:[%s4271_s8 + $0x184] ss:$24 sps:$4 sm:$0xff]   ;;  %v3494_v2 = vld [vmem:[%s4271_s8 + $0x8] ss:$24 sps:$4 sm:$0xff]   ;;  %v3501_v8 = vld [vmem:[%s4271_s8 + $0x2d8] ss:$24 sps:$4 sm:$0xff]  }
  0xb6   : > { %1275 = vmatpush1.bf16.msra.mxu0 %v3435_v24  ;;  %v3496_v1 = vld [vmem:[%s4271_s8 + $0xc] ss:$24 sps:$4 sm:$0xff]   ;;  %v3497_v4 = vld [vmem:[%s4271_s8 + $0x180] ss:$24 sps:$4 sm:$0xff]   ;;  %v3503_v5 = vld [vmem:[%s4271_s8 + $0x2dc] ss:$24 sps:$4 sm:$0xff]  }
  0xb7   : > { %1318 = vmatpush1.bf16.msra.mxu1 %v3436_v25  ;;  %1276 = vmatprep.subr.bf16.mxu0 %v3437_v26  ;;  %v3506_v6 = vld [vmem:[%s4271_s8 + $0x45c] ss:$24 sps:$4 sm:$0xff]   ;;  %v3504_v9 = vld [vmem:[%s4271_s8 + $0x458] ss:$24 sps:$4 sm:$0xff]   ;;  %v3509_v10 = vld [vmem:[%s4271_s8 + $0x2ac] ss:$24 sps:$4 sm:$0xff]  }
  0xb8   : > { %1319 = vmatprep.subr.bf16.mxu1 %v3439_v27  ;;  %v4366_v7 = vld [vmem:[#allocation3] ss:$12 sps:$4 sm:$0xff]   ;;  %v3512_v11 = vld [vmem:[%s4271_s8 + $0x42c] ss:$24 sps:$4 sm:$0xff]   ;;  %v3513_v16 = vld [vmem:[%s4271_s8 + $0x278] ss:$24 sps:$4 sm:$0xff]  }
  0xb9   : > { %v3507_v12 = vld [vmem:[%s4271_s8 + $0x2a8] ss:$24 sps:$4 sm:$0xff]   ;;  %v3515_v14 = vld [vmem:[%s4271_s8 + $0x27c] ss:$24 sps:$4 sm:$0xff]   ;;  %v3516_v17 = vld [vmem:[%s4271_s8 + $0x3f8] ss:$24 sps:$4 sm:$0xff]  }
  0xba   : > { %1277 = vmatpush1.bf16.msra.mxu0 %v3441_v28  ;;  %v3510_v13 = vld [vmem:[%s4271_s8 + $0x428] ss:$24 sps:$4 sm:$0xff]   ;;  %v3518_v15 = vld [vmem:[%s4271_s8 + $0x3fc] ss:$24 sps:$4 sm:$0xff]   ;;  %v3521_v18 = vld [vmem:[%s4271_s8 + $0x24c] ss:$24 sps:$4 sm:$0xff]  }
  0xbb   : > { %1320 = vmatpush1.bf16.msra.mxu1 %v3442_v29  ;;  %1278 = vmatprep.subr.bf16.mxu0 %v3443_v30  ;;  %v3524_v19 = vld [vmem:[%s4271_s8 + $0x3cc] ss:$24 sps:$4 sm:$0xff]   ;;  %v3519_v20 = vld [vmem:[%s4271_s8 + $0x248] ss:$24 sps:$4 sm:$0xff]   ;;  %v3527_v22 = vld [vmem:[%s4271_s8 + $0x21c] ss:$24 sps:$4 sm:$0xff]  }
  0xbc   : > { %1321 = vmatprep.subr.bf16.mxu1 %v3445_v31  ;;  %v3522_v21 = vld [vmem:[%s4271_s8 + $0x3c8] ss:$24 sps:$4 sm:$0xff]   ;;  %v3530_v23 = vld [vmem:[%s4271_s8 + $0x39c] ss:$24 sps:$4 sm:$0xff]   ;;  %v3525_v24 = vld [vmem:[%s4271_s8 + $0x218] ss:$24 sps:$4 sm:$0xff]  }
  0xbd   : > { %v3528_v25 = vld [vmem:[%s4271_s8 + $0x398] ss:$24 sps:$4 sm:$0xff]   ;;  %v3533_v26 = vld [vmem:[%s4271_s8 + $0x1ec] ss:$24 sps:$4 sm:$0xff]   ;;  %v3531_v28 = vld [vmem:[%s4271_s8 + $0x1e8] ss:$24 sps:$4 sm:$0xff]  }
  0xbe   : > { %1279 = vmatpush1.bf16.msra.mxu0 %v3447_v32  ;;  %v3536_v27 = vld [vmem:[%s4271_s8 + $0x36c] ss:$24 sps:$4 sm:$0xff]   ;;  %v3534_v29 = vld [vmem:[%s4271_s8 + $0x368] ss:$24 sps:$4 sm:$0xff]   ;;  %v3539_v30 = vld [vmem:[%s4271_s8 + $0x1bc] ss:$24 sps:$4 sm:$0xff]  }
  0xbf   : > { %1322 = vmatpush1.bf16.msra.mxu1 %v3448_v33  ;;  %1280 = vmatprep.subr.bf16.mxu0 %v3449_v34  ;;  %v3542_v31 = vld [vmem:[%s4271_s8 + $0x33c] ss:$24 sps:$4 sm:$0xff]   ;;  %v3537_v32 = vld [vmem:[%s4271_s8 + $0x1b8] ss:$24 sps:$4 sm:$0xff]   ;;  %v3545_v34 = vld [vmem:[%s4271_s8 + $0x18c] ss:$24 sps:$4 sm:$0xff]  }
  0xc0   : > { %1350 = vmatprep.subr.bf16.mxu1 %v3453_v35  ;;  %v3540_v33 = vld [vmem:[%s4271_s8 + $0x338] ss:$24 sps:$4 sm:$0xff]   ;;  %v3548_v35 = vld [vmem:[%s4271_s8 + $0x30c] ss:$24 sps:$4 sm:$0xff]  }
  0xc2   : > { %1340 = vmatmul.mubr.bf16.vlgmr.msra.gmra.mxu1 %v4327_v36  ;;  %1281 = vmatpush2.bf16.msra.mxu0 %v3454_v38  ;;  %v3546_v38 = vld [vmem:[%s4271_s8 + $0x308] ss:$24 sps:$4 sm:$0xff]  }
  0xc3   : > { %1351 = vmatpush1.bf16.msra.mxu1 %v3451_v37  ;;  %1282 = vmatprep.subr.bf16.mxu0 %v3456_v39  ;;  %v3543_v37 = vld [vmem:[%s4271_s8 + $0x188] ss:$24 sps:$4 sm:$0xff]   ;;  %v3551_v39 = vld [vmem:[%s4271_s8 + $0x164] ss:$24 sps:$4 sm:$0xff]  }
  0xc4   : > { %1352 = vmatprep.subr.bf16.mxu1 %v3460_v40  ;;  %1382 = vmatprep.mubr.bf16.mxu1 %v4345_v52  ;;  %v3575_v40 = vld [vmem:[%s4271_s8 + $0x464] ss:$24 sps:$4 sm:$0xff]  }
  0xc6   : > { %1283 = vmatpush2.bf16.msra.mxu0 %v3461_v42  ;;  %v3554_v42 = vld [vmem:[%s4271_s8 + $0x134] ss:$24 sps:$4 sm:$0xff]  }
  0xc7   : > { %1353 = vmatpush1.bf16.msra.mxu1 %v3458_v41  ;;  %1284 = vmatprep.subr.bf16.mxu0 %v3462_v43  ;;  %v3549_v41 = vld [vmem:[%s4271_s8 + $0x160] ss:$24 sps:$4 sm:$0xff]  }
  0xc8   : > { %1354 = vmatprep.subr.bf16.mxu1 %v3466_v44  ;;  %v3573_v43 = vld [vmem:[%s4271_s8 + $0x460] ss:$24 sps:$4 sm:$0xff]   ;;  %v3581_v44 = vld [vmem:[%s4271_s8 + $0x434] ss:$24 sps:$4 sm:$0xff]  }
  0xca   : > { %1285 = vmatpush2.bf16.msra.mxu0 %v3467_v46  ;;  %v3557_v46 = vld [vmem:[%s4271_s8 + $0x104] ss:$24 sps:$4 sm:$0xff]  }
  0xcb   : > { %1355 = vmatpush1.bf16.msra.mxu1 %v3464_v45  ;;  %1286 = vmatprep.subr.bf16.mxu0 %v3468_v47  ;;  %v3552_v45 = vld [vmem:[%s4271_s8 + $0x130] ss:$24 sps:$4 sm:$0xff]  }
  0xcc   : > { %1356 = vmatprep.subr.bf16.mxu1 %v3472_v48  ;;  %v3579_v47 = vld [vmem:[%s4271_s8 + $0x430] ss:$24 sps:$4 sm:$0xff]   ;;  %v3587_v48 = vld [vmem:[%s4271_s8 + $0x404] ss:$24 sps:$4 sm:$0xff]  }
  0xce   : > { %1287 = vmatpush2.bf16.msra.mxu0 %v3473_v50  ;;  %v3560_v50 = vld [vmem:[%s4271_s8 + $0xd4] ss:$24 sps:$4 sm:$0xff]  }
  0xcf   : > { %1357 = vmatpush1.bf16.msra.mxu1 %v3470_v49  ;;  %1288 = vmatprep.subr.bf16.mxu0 %v3474_v51  ;;  %v3555_v49 = vld [vmem:[%s4271_s8 + $0x100] ss:$24 sps:$4 sm:$0xff]  }
  0xd0   : > { %1358 = vmatprep.subr.bf16.mxu1 %v3478_v53  ;;  %v3585_v51 = vld [vmem:[%s4271_s8 + $0x400] ss:$24 sps:$4 sm:$0xff]   ;;  %v3593_v53 = vld [vmem:[%s4271_s8 + $0x3d4] ss:$24 sps:$4 sm:$0xff]  }
  0xd2   : > { %1289 = vmatpush2.bf16.msra.mxu0 %v3479_v55  ;;  %v3563_v55 = vld [vmem:[%s4271_s8 + $0xa4] ss:$24 sps:$4 sm:$0xff]  }
  0xd3   : > { %1359 = vmatpush1.bf16.msra.mxu1 %v3476_v54  ;;  %1290 = vmatprep.subr.bf16.mxu0 %v3480_v56  ;;  %v3558_v54 = vld [vmem:[%s4271_s8 + $0xd0] ss:$24 sps:$4 sm:$0xff]   ;;  %v3561_v56 = vld [vmem:[%s4271_s8 + $0xa0] ss:$24 sps:$4 sm:$0xff]  }
  0xd4   : > { %1360 = vmatprep.subr.bf16.mxu1 %v3484_v57  ;;  %v3566_v57 = vld [vmem:[%s4271_s8 + $0x74] ss:$24 sps:$4 sm:$0xff]  }
  0xd6   : > { %1291 = vmatpush2.bf16.msra.mxu0 %v3485_v59  ;;  %v3605_v59 = vld [vmem:[%s4271_s8 + $0x374] ss:$24 sps:$4 sm:$0xff]  }
  0xd7   : > { %1361 = vmatpush1.bf16.msra.mxu1 %v3482_v58  ;;  %1292 = vmatprep.subr.bf16.mxu0 %v3486_v60  ;;  %v3597_v58 = vld [vmem:[%s4271_s8 + $0x3a0] ss:$24 sps:$4 sm:$0xff]   ;;  %v3564_v60 = vld [vmem:[%s4271_s8 + $0x70] ss:$24 sps:$4 sm:$0xff]  }
  0xd8   : > { %1362 = vmatprep.subr.bf16.mxu1 %v3490_v61  ;;  %v3569_v61 = vld [vmem:[%s4271_s8 + $0x44] ss:$24 sps:$4 sm:$0xff]  }
  0xda   : > { %1293 = vmatpush2.bf16.msra.mxu0 %v3491_v63  ;;  %v3611_v63 = vld [vmem:[%s4271_s8 + $0x344] ss:$24 sps:$4 sm:$0xff]  }
  0xdb   : > { %1363 = vmatpush1.bf16.msra.mxu1 %v3488_v62  ;;  %1294 = vmatprep.subr.bf16.mxu0 %v3492_v0  ;;  %v3603_v62 = vld [vmem:[%s4271_s8 + $0x370] ss:$24 sps:$4 sm:$0xff]   ;;  %v3567_v0 = vld [vmem:[%s4271_s8 + $0x40] ss:$24 sps:$4 sm:$0xff]  }
  0xdc   : > { %1364 = vmatprep.subr.bf16.mxu1 %v3496_v1  ;;  %v3572_v1 = vld [vmem:[%s4271_s8 + $0x14] ss:$24 sps:$4 sm:$0xff]  }
  0xde   : > { %1295 = vmatpush2.bf16.msra.mxu0 %v3497_v4  ;;  %v3617_v4 = vld [vmem:[%s4271_s8 + $0x314] ss:$24 sps:$4 sm:$0xff]  }
  0xdf   : > { %1365 = vmatpush1.bf16.msra.mxu1 %v3494_v2  ;;  %1393 = vmatprep.subr.bf16.mxu0 %v3506_v6  ;;  %v3609_v2 = vld [vmem:[%s4271_s8 + $0x340] ss:$24 sps:$4 sm:$0xff]   ;;  %v3615_v6 = vld [vmem:[%s4271_s8 + $0x310] ss:$24 sps:$4 sm:$0xff]  }
  0xe0   : > { %1366 = vmatprep.subr.bf16.mxu1 %v3503_v5  ;;  %v3570_v5 = vld [vmem:[%s4271_s8 + $0x10] ss:$24 sps:$4 sm:$0xff]  }
  0xe1   : > { %1297 = vmatmul.mubr.bf16.vlgmr.msra.gmra.mxu0 %v4366_v7 }
  0xe2   : > { %1394 = vmatpush1.bf16.msra.mxu0 %v3504_v9  ;;  %1425 = vmatprep.mubr.bf16.mxu0 %v4036_v3  ;;  %v3623_v9 = vld [vmem:[%s4280_s27 + $0xac] ss:$12 sps:$4 sm:$0xff]  }
  0xe3   : > { %1367 = vmatpush2.bf16.msra.mxu1 %v3501_v8  ;;  %1395 = vmatprep.subr.bf16.mxu0 %v3512_v11  ;;  %v3578_v8 = vld [vmem:[%s4271_s8 + $0x2e4] ss:$24 sps:$4 sm:$0xff]   ;;  %v3621_v11 = vld [vmem:[%s4280_s27 + $0xa8] ss:$12 sps:$4 sm:$0xff]  }
  0xe4   : > { %1368 = vmatprep.subr.bf16.mxu1 %v3509_v10  ;;  %v3576_v10 = vld [vmem:[%s4271_s8 + $0x2e0] ss:$24 sps:$4 sm:$0xff]  }
  0xe6   : > { %1396 = vmatpush1.bf16.msra.mxu0 %v3510_v13  ;;  %v3626_v13 = vld [vmem:[%s4280_s27 + $0x94] ss:$12 sps:$4 sm:$0xff]  }
  0xe7   : > { %1369 = vmatpush2.bf16.msra.mxu1 %v3507_v12  ;;  %1397 = vmatprep.subr.bf16.mxu0 %v3518_v15  ;;  %v3584_v12 = vld [vmem:[%s4271_s8 + $0x2b4] ss:$24 sps:$4 sm:$0xff]   ;;  %v3624_v15 = vld [vmem:[%s4280_s27 + $0x90] ss:$12 sps:$4 sm:$0xff]  }
  0xe8   : > { %1370 = vmatprep.subr.bf16.mxu1 %v3515_v14  ;;  %v3582_v14 = vld [vmem:[%s4271_s8 + $0x2b0] ss:$24 sps:$4 sm:$0xff]  }
  0xea   : > { %1398 = vmatpush1.bf16.msra.mxu0 %v3516_v17  ;;  %v3629_v17 = vld [vmem:[%s4280_s27 + $0x7c] ss:$12 sps:$4 sm:$0xff]  }
  0xeb   : > { %1371 = vmatpush2.bf16.msra.mxu1 %v3513_v16  ;;  %1399 = vmatprep.subr.bf16.mxu0 %v3524_v19  ;;  %v3590_v16 = vld [vmem:[%s4271_s8 + $0x284] ss:$24 sps:$4 sm:$0xff]  }
  0xec   : > { %1372 = vmatprep.subr.bf16.mxu1 %v3521_v18  ;;  %v3588_v18 = vld [vmem:[%s4271_s8 + $0x280] ss:$24 sps:$4 sm:$0xff]   ;;  %v3627_v19 = vld [vmem:[%s4280_s27 + $0x78] ss:$12 sps:$4 sm:$0xff]  }
  0xee   : > { %1400 = vmatpush1.bf16.msra.mxu0 %v3522_v21  ;;  %v3594_v21 = vld [vmem:[%s4271_s8 + $0x250] ss:$24 sps:$4 sm:$0xff]  }
  0xef   : > { %1373 = vmatpush2.bf16.msra.mxu1 %v3519_v20  ;;  %1401 = vmatprep.subr.bf16.mxu0 %v3530_v23  ;;  %v3632_v20 = vld [vmem:[%s4280_s27 + $0x64] ss:$12 sps:$4 sm:$0xff]  }
  0xf0   : > { %1374 = vmatprep.subr.bf16.mxu1 %v3527_v22  ;;  %v3630_v22 = vld [vmem:[%s4280_s27 + $0x60] ss:$12 sps:$4 sm:$0xff]   ;;  %v3602_v23 = vld [vmem:[%s4271_s8 + $0x224] ss:$24 sps:$4 sm:$0xff]  }
  0xf2   : > { %1402 = vmatpush1.bf16.msra.mxu0 %v3528_v25  ;;  %v3600_v25 = vld [vmem:[%s4271_s8 + $0x220] ss:$24 sps:$4 sm:$0xff]  }
  0xf3   : > { %1375 = vmatpush2.bf16.msra.mxu1 %v3525_v24  ;;  %1403 = vmatprep.subr.bf16.mxu0 %v3536_v27  ;;  %v3635_v24 = vld [vmem:[%s4280_s27 + $0x4c] ss:$12 sps:$4 sm:$0xff]   ;;  %v3633_v27 = vld [vmem:[%s4280_s27 + $0x48] ss:$12 sps:$4 sm:$0xff]  }
  0xf4   : > { %1376 = vmatprep.subr.bf16.mxu1 %v3533_v26  ;;  %v3608_v26 = vld [vmem:[%s4271_s8 + $0x1f4] ss:$24 sps:$4 sm:$0xff]  }
  0xf6   : > { %1404 = vmatpush1.bf16.msra.mxu0 %v3534_v29  ;;  %v3606_v29 = vld [vmem:[%s4271_s8 + $0x1f0] ss:$24 sps:$4 sm:$0xff]  }
  0xf7   : > { %1377 = vmatpush2.bf16.msra.mxu1 %v3531_v28  ;;  %1405 = vmatprep.subr.bf16.mxu0 %v3542_v31  ;;  %v3638_v28 = vld [vmem:[%s4280_s27 + $0x34] ss:$12 sps:$4 sm:$0xff]   ;;  %v3614_v31 = vld [vmem:[%s4271_s8 + $0x1c4] ss:$24 sps:$4 sm:$0xff]  }
  0xf8   : > { %1378 = vmatprep.subr.bf16.mxu1 %v3539_v30  ;;  %v3636_v30 = vld [vmem:[%s4280_s27 + $0x30] ss:$12 sps:$4 sm:$0xff]  }
  0xfa   : > { %1406 = vmatpush1.bf16.msra.mxu0 %v3540_v33  ;;  %v3612_v33 = vld [vmem:[%s4271_s8 + $0x1c0] ss:$24 sps:$4 sm:$0xff]  }
  0xfb   : > { %1379 = vmatpush2.bf16.msra.mxu1 %v3537_v32  ;;  %1407 = vmatprep.subr.bf16.mxu0 %v3548_v35  ;;  %v3641_v32 = vld [vmem:[%s4280_s27 + $0x1c] ss:$12 sps:$4 sm:$0xff]  }
  0xfc   : > { %1380 = vmatprep.subr.bf16.mxu1 %v3545_v34  ;;  %v3639_v34 = vld [vmem:[%s4280_s27 + $0x18] ss:$12 sps:$4 sm:$0xff]   ;;  %v3620_v35 = vld [vmem:[%s4271_s8 + $0x194] ss:$24 sps:$4 sm:$0xff]  }
  0xfe   : > { %1408 = vmatpush1.bf16.msra.mxu0 %v3546_v38  ;;  %v3618_v38 = vld [vmem:[%s4271_s8 + $0x190] ss:$24 sps:$4 sm:$0xff]  }
  0xff   : > { %1381 = vmatpush2.bf16.msra.mxu1 %v3543_v37  ;;  %1436 = vmatprep.subr.bf16.mxu0 %v3551_v39  ;;  %v3644_v37 = vld [vmem:[%s4280_s27 + $0x4] ss:$12 sps:$4 sm:$0xff]   ;;  %v3642_v39 = vld [vmem:[%s4280_s27] ss:$12 sps:$4 sm:$0xff]  }
 0x100   : > { %1479 = vmatprep.subr.bf16.mxu1 %v3575_v40  ;;  %v3647_v40 = vld [vmem:[%s4280_s27 + $0x22c] ss:$12 sps:$4 sm:$0xff]  }
 0x101   : > { %1426 = vmatmul.mubr.bf16.vlgmr.msra.gmra.mxu0 %v4327_v36 }
 0x102   : > { %1383 = vmatmul.mubr.bf16.vlgmr.msra.gmra.mxu1 %v4366_v7  ;;  %1437 = vmatpush1.bf16.msra.mxu0 %v3549_v41  ;;  %v3650_v41 = vld [vmem:[%s4280_s27 + $0x16c] ss:$12 sps:$4 sm:$0xff]  }
 0x103   : > { %1480 = vmatpush1.bf16.msra.mxu1 %v3573_v43  ;;  %1438 = vmatprep.subr.bf16.mxu0 %v3554_v42  ;;  %v3645_v42 = vld [vmem:[%s4280_s27 + $0x228] ss:$12 sps:$4 sm:$0xff]  }
 0x104   : > { %1481 = vmatprep.subr.bf16.mxu1 %v3581_v44  ;;  %1511 = vmatprep.mubr.bf16.mxu1 %v4036_v3  ;;  %v3591_v3 = vld [vmem:[%s4271_s8 + $0x3d0] ss:$24 sps:$4 sm:$0xff]   ;;  %v3648_v43 = vld [vmem:[%s4280_s27 + $0x168] ss:$12 sps:$4 sm:$0xff]  }
 0x105   : > { %1468 = vmatprep.mubr.bf16.mxu0 %v4345_v52  ;;  %v3599_v52 = vld [vmem:[%s4271_s8 + $0x3a4] ss:$24 sps:$4 sm:$0xff]   ;;  %v3653_v44 = vld [vmem:[%s4280_s27 + $0x214] ss:$12 sps:$4 sm:$0xff]  }
 0x106   : > { %1439 = vmatpush1.bf16.msra.mxu0 %v3552_v45  ;;  %v3656_v45 = vld [vmem:[%s4280_s27 + $0x154] ss:$12 sps:$4 sm:$0xff]  }
 0x107   : > { %1482 = vmatpush1.bf16.msra.mxu1 %v3579_v47  ;;  %1440 = vmatprep.subr.bf16.mxu0 %v3557_v46  ;;  %v3651_v46 = vld [vmem:[%s4280_s27 + $0x210] ss:$12 sps:$4 sm:$0xff]  }
 0x108   : > { %1483 = vmatprep.subr.bf16.mxu1 %v3587_v48  ;;  %v3654_v47 = vld [vmem:[%s4280_s27 + $0x150] ss:$12 sps:$4 sm:$0xff]  }
 0x109   : > { %v3659_v48 = vld [vmem:[%s4280_s27 + $0x1fc] ss:$12 sps:$4 sm:$0xff]  }
 0x10a   : > { %1441 = vmatpush1.bf16.msra.mxu0 %v3555_v49  ;;  %v3662_v49 = vld [vmem:[%s4280_s27 + $0x13c] ss:$12 sps:$4 sm:$0xff]  }
 0x10b   : > { %1484 = vmatpush1.bf16.msra.mxu1 %v3585_v51  ;;  %1442 = vmatprep.subr.bf16.mxu0 %v3560_v50  ;;  %v3657_v50 = vld [vmem:[%s4280_s27 + $0x1f8] ss:$12 sps:$4 sm:$0xff]  }
 0x10c   : > { %1485 = vmatprep.subr.bf16.mxu1 %v3593_v53  ;;  %v3660_v51 = vld [vmem:[%s4280_s27 + $0x138] ss:$12 sps:$4 sm:$0xff]  }
 0x10d   : > { %v3665_v53 = vld [vmem:[%s4280_s27 + $0x1e4] ss:$12 sps:$4 sm:$0xff]  }
 0x10e   : > { %1443 = vmatpush1.bf16.msra.mxu0 %v3558_v54  ;;  %v3663_v54 = vld [vmem:[%s4280_s27 + $0x1e0] ss:$12 sps:$4 sm:$0xff]  }
 0x10f   : > { %1486 = vmatpush1.bf16.msra.mxu1 %v3591_v3  ;;  %1444 = vmatprep.subr.bf16.mxu0 %v3563_v55  ;;  %v3666_v55 = vld [vmem:[%s4280_s27 + $0x120] ss:$12 sps:$4 sm:$0xff]  }
 0x110   : > { %1487 = vmatprep.subr.bf16.mxu1 %v3599_v52  ;;  %v3671_v3 = vld [vmem:[%s4280_s27 + $0x1cc] ss:$12 sps:$4 sm:$0xff]  }
 0x111   : > { %v3674_v52 = vld [vmem:[%s4280_s27 + $0x10c] ss:$12 sps:$4 sm:$0xff]  }
 0x112   : > { %1445 = vmatpush1.bf16.msra.mxu0 %v3561_v56  ;;  %v3669_v56 = vld [vmem:[%s4280_s27 + $0x1c8] ss:$12 sps:$4 sm:$0xff]  }
 0x113   : > { %1488 = vmatpush1.bf16.msra.mxu1 %v3597_v58  ;;  %1446 = vmatprep.subr.bf16.mxu0 %v3566_v57  ;;  %v3672_v57 = vld [vmem:[%s4280_s27 + $0x108] ss:$12 sps:$4 sm:$0xff]  }
 0x114   : > { %1489 = vmatprep.subr.bf16.mxu1 %v3605_v59  ;;  %v3677_v58 = vld [vmem:[%s4280_s27 + $0x1b4] ss:$12 sps:$4 sm:$0xff]  }
 0x115   : > { %v3680_v59 = vld [vmem:[%s4280_s27 + $0xf4] ss:$12 sps:$4 sm:$0xff]  }
 0x116   : > { %1447 = vmatpush1.bf16.msra.mxu0 %v3564_v60  ;;  %v3675_v60 = vld [vmem:[%s4280_s27 + $0x1b0] ss:$12 sps:$4 sm:$0xff]  }
 0x117   : > { %1490 = vmatpush1.bf16.msra.mxu1 %v3603_v62  ;;  %1448 = vmatprep.subr.bf16.mxu0 %v3569_v61  ;;  %v3678_v61 = vld [vmem:[%s4280_s27 + $0xf0] ss:$12 sps:$4 sm:$0xff]  }
 0x118   : > { %1491 = vmatprep.subr.bf16.mxu1 %v3611_v63  ;;  %v3683_v62 = vld [vmem:[%s4280_s27 + $0x19c] ss:$12 sps:$4 sm:$0xff]  }
 0x119   : > { %v3686_v63 = vld [vmem:[%s4280_s27 + $0xdc] ss:$12 sps:$4 sm:$0xff]  }
 0x11a   : > { %1449 = vmatpush1.bf16.msra.mxu0 %v3567_v0  ;;  %v3681_v0 = vld [vmem:[%s4280_s27 + $0x198] ss:$12 sps:$4 sm:$0xff]  }
 0x11b   : > { %1492 = vmatpush1.bf16.msra.mxu1 %v3609_v2  ;;  %1450 = vmatprep.subr.bf16.mxu0 %v3572_v1  ;;  %v3684_v1 = vld [vmem:[%s4280_s27 + $0xd8] ss:$12 sps:$4 sm:$0xff]  }
 0x11c   : > { %1493 = vmatprep.subr.bf16.mxu1 %v3617_v4  ;;  %v3689_v2 = vld [vmem:[%s4280_s27 + $0x184] ss:$12 sps:$4 sm:$0xff]  }
 0x11d   : > { %v3692_v4 = vld [vmem:[%s4280_s27 + $0xc4] ss:$12 sps:$4 sm:$0xff]  }
 0x11e   : > { %1451 = vmatpush1.bf16.msra.mxu0 %v3570_v5  ;;  %v3687_v5 = vld [vmem:[%s4280_s27 + $0x180] ss:$12 sps:$4 sm:$0xff]  }
 0x11f   : > { %1494 = vmatpush1.bf16.msra.mxu1 %v3615_v6  ;;  %1452 = vmatprep.subr.bf16.mxu0 %v3578_v8  ;;  %v3690_v6 = vld [vmem:[%s4280_s27 + $0xc0] ss:$12 sps:$4 sm:$0xff]  }
 0x120   : > { %2506 = vmatprep.subr.bf16.mxu1 %v3623_v9  ;;  %v3695_v8 = vld [vmem:[%s4280_s27 + $0x2ec] ss:$12 sps:$4 sm:$0xff]  }
 0x121   : > { %v3719_v9 = vld [vmem:[%s4280_s27 + $0x3ac] ss:$12 sps:$4 sm:$0xff]  }
 0x122   : > { %1512 = vmatmul.mubr.bf16.vlgmr.msra.gmra.mxu1 %v4327_v36  ;;  %1453 = vmatpush2.bf16.msra.mxu0 %v3576_v10  ;;  %v3596_v36 = vld [vmem:[%s4271_s8 + $0x254] ss:$24 sps:$4 sm:$0xff]  }
 0x123   : > { %2507 = vmatpush1.bf16.msra.mxu1 %v3621_v11  ;;  %1454 = vmatprep.subr.bf16.mxu0 %v3584_v12  ;;  %v3693_v10 = vld [vmem:[%s4280_s27 + $0x2e8] ss:$12 sps:$4 sm:$0xff]   ;;  %v3696_v12 = vld [vmem:[%s4280_s27 + $0x2d0] ss:$12 sps:$4 sm:$0xff]  }
 0x124   : > { %2508 = vmatprep.subr.bf16.mxu1 %v3626_v13  ;;  %v3698_v11 = vld [vmem:[%s4280_s27 + $0x2d4] ss:$12 sps:$4 sm:$0xff]   ;;  %v3701_v13 = vld [vmem:[%s4280_s27 + $0x2bc] ss:$12 sps:$4 sm:$0xff]  }
 0x126   : > { %1455 = vmatpush2.bf16.msra.mxu0 %v3582_v14  ;;  %v3699_v14 = vld [vmem:[%s4280_s27 + $0x2b8] ss:$12 sps:$4 sm:$0xff]  }
 0x127   : > { %2509 = vmatpush1.bf16.msra.mxu1 %v3624_v15  ;;  %1456 = vmatprep.subr.bf16.mxu0 %v3590_v16  ;;  %v3704_v15 = vld [vmem:[%s4280_s27 + $0x2a4] ss:$12 sps:$4 sm:$0xff]   ;;  %v3702_v16 = vld [vmem:[%s4280_s27 + $0x2a0] ss:$12 sps:$4 sm:$0xff]  }
 0x128   : > { %2510 = vmatprep.subr.bf16.mxu1 %v3629_v17  ;;  %v3707_v17 = vld [vmem:[%s4280_s27 + $0x28c] ss:$12 sps:$4 sm:$0xff]  }
 0x12a   : > { %1457 = vmatpush2.bf16.msra.mxu0 %v3588_v18  ;;  %v3705_v18 = vld [vmem:[%s4280_s27 + $0x288] ss:$12 sps:$4 sm:$0xff]  }
 0x12b   : > { %2511 = vmatpush1.bf16.msra.mxu1 %v3627_v19  ;;  %1458 = vmatprep.subr.bf16.mxu0 %v3596_v36  ;;  %v3710_v19 = vld [vmem:[%s4280_s27 + $0x274] ss:$12 sps:$4 sm:$0xff]   ;;  %v3708_v36 = vld [vmem:[%s4280_s27 + $0x270] ss:$12 sps:$4 sm:$0xff]  }
 0x12c   : > { %2512 = vmatprep.subr.bf16.mxu1 %v3632_v20  ;;  %v3713_v20 = vld [vmem:[%s4280_s27 + $0x25c] ss:$12 sps:$4 sm:$0xff]  }
 0x12e   : > { %1459 = vmatpush2.bf16.msra.mxu0 %v3594_v21  ;;  %v3711_v21 = vld [vmem:[%s4280_s27 + $0x258] ss:$12 sps:$4 sm:$0xff]  }
 0x12f   : > { %2513 = vmatpush1.bf16.msra.mxu1 %v3630_v22  ;;  %1460 = vmatprep.subr.bf16.mxu0 %v3602_v23  ;;  %v3716_v22 = vld [vmem:[%s4280_s27 + $0x244] ss:$12 sps:$4 sm:$0xff]   ;;  %v3714_v23 = vld [vmem:[%s4280_s27 + $0x240] ss:$12 sps:$4 sm:$0xff]  }
 0x130   : > { %2514 = vmatprep.subr.bf16.mxu1 %v3635_v24  ;;  %v3720_v24 = vld [vmem:[%s4280_s27 + $0x170] ss:$12 sps:$4 sm:$0xff]  }
 0x132   : > { %1461 = vmatpush2.bf16.msra.mxu0 %v3600_v25  ;;  %v498_v25 = vlaneseq }
 0x133   : > { %2515 = vmatpush1.bf16.msra.mxu1 %v3633_v27  ;;  %1462 = vmatprep.subr.bf16.mxu0 %v3608_v26 }
 0x134   : > { %2516 = vmatprep.subr.bf16.mxu1 %v3638_v28  ;;  %v4520_v26 = vshrl.u32 %v498_v25, 7 }
 0x136   : > { %1463 = vmatpush2.bf16.msra.mxu0 %v3606_v29  ;;  %v504_v27 = vsub.s32 1, %v4520_v26  ;;  %v500_v29 = vsub.s32 0, %v4520_v26 }
 0x137   : > { %2517 = vmatpush1.bf16.msra.mxu1 %v3636_v30  ;;  %1464 = vmatprep.subr.bf16.mxu0 %v3614_v31  ;;  %v4526_v30 = vld [vmem:[%s289_s24] sm:$0x3f] }
 0x138   : > { %2518 = vmatprep.subr.bf16.mxu1 %v3641_v32  ;;  %v505_v31 = vrot.slane %v4526_v30, %v504_v27 }
 0x13a   : > { %1465 = vmatpush2.bf16.msra.mxu0 %v3612_v33  ;;  %v501_v33 = vrot.slane %v4526_v30, %v500_v29 }
 0x13b   : > { %2519 = vmatpush1.bf16.msra.mxu1 %v3639_v34  ;;  %1466 = vmatprep.subr.bf16.mxu0 %v3620_v35 }
 0x13c   : > { %2520 = vmatprep.subr.bf16.mxu1 %v3644_v37 }
 0x13e   : > { %1467 = vmatpush2.bf16.msra.mxu0 %v3618_v38 }
 0x13f   : > { %2521 = vmatpush1.bf16.msra.mxu1 %v3642_v39  ;;  %2549 = vmatprep.subr.bf16.mxu0 %v3647_v40 }
 0x140   : > { %2522 = vmatprep.subr.bf16.mxu1 %v3650_v41 }
 0x141   : > { %1469 = vmatmul.mubr.bf16.vlgmr.msra.gmra.mxu0 %v4366_v7  ;;  %v3668_v7 = vld [vmem:[%s4280_s27 + $0x124] ss:$12 sps:$4 sm:$0xff]  }
 0x142   : > { %2550 = vmatpush1.bf16.msra.mxu0 %v3645_v42 }
 0x143   : > { %2523 = vmatpush2.bf16.msra.mxu1 %v3648_v43  ;;  %2551 = vmatprep.subr.bf16.mxu0 %v3653_v44 }
 0x144   : > { %2524 = vmatprep.subr.bf16.mxu1 %v3656_v45 }
 0x146   : > { %2552 = vmatpush1.bf16.msra.mxu0 %v3651_v46 }
 0x147   : > { %2525 = vmatpush2.bf16.msra.mxu1 %v3654_v47  ;;  %2553 = vmatprep.subr.bf16.mxu0 %v3659_v48 }
 0x148   : > { %2526 = vmatprep.subr.bf16.mxu1 %v3662_v49 }
 0x14a   : > { %2554 = vmatpush1.bf16.msra.mxu0 %v3657_v50 }
 0x14b   : > { %2527 = vmatpush2.bf16.msra.mxu1 %v3660_v51  ;;  %2555 = vmatprep.subr.bf16.mxu0 %v3665_v53 }
 0x14c   : > { %2528 = vmatprep.subr.bf16.mxu1 %v3668_v7 }
 0x14e   : > { %2556 = vmatpush1.bf16.msra.mxu0 %v3663_v54  ;;  %v3717_v54 = vld [vmem:[%s4280_s27 + $0x3a8] ss:$12 sps:$4 sm:$0xff]  }
 0x14f   : > { %2529 = vmatpush2.bf16.msra.mxu1 %v3666_v55  ;;  %2557 = vmatprep.subr.bf16.mxu0 %v3671_v3  ;;  %v3724_v3 = vld [vmem:[%s4280_s27 + $0x394] ss:$12 sps:$4 sm:$0xff]  }
 0x150   : > { %2530 = vmatprep.subr.bf16.mxu1 %v3674_v52  ;;  %v3722_v52 = vld [vmem:[%s4280_s27 + $0x390] ss:$12 sps:$4 sm:$0xff]  }
 0x152   : > { %2558 = vmatpush1.bf16.msra.mxu0 %v3669_v56  ;;  %v3729_v56 = vld [vmem:[%s4280_s27 + $0x37c] ss:$12 sps:$4 sm:$0xff]  }
 0x153   : > { %2531 = vmatpush2.bf16.msra.mxu1 %v3672_v57  ;;  %2559 = vmatprep.subr.bf16.mxu0 %v3677_v58  ;;  %v3727_v57 = vld [vmem:[%s4280_s27 + $0x378] ss:$12 sps:$4 sm:$0xff]  }
 0x154   : > { %2532 = vmatprep.subr.bf16.mxu1 %v3680_v59  ;;  %v3734_v58 = vld [vmem:[%s4280_s27 + $0x364] ss:$12 sps:$4 sm:$0xff]   ;;  %v3732_v59 = vld [vmem:[%s4280_s27 + $0x360] ss:$12 sps:$4 sm:$0xff]  }
 0x156   : > { %2560 = vmatpush1.bf16.msra.mxu0 %v3675_v60  ;;  %v3739_v60 = vld [vmem:[%s4280_s27 + $0x34c] ss:$12 sps:$4 sm:$0xff]  }
 0x157   : > { %2533 = vmatpush2.bf16.msra.mxu1 %v3678_v61  ;;  %2561 = vmatprep.subr.bf16.mxu0 %v3683_v62  ;;  %v512_v61 = vsub.s32 3, %v4520_v26  ;;  %v508_v62 = vsub.s32 2, %v4520_v26 }
 0x158   : > { %2534 = vmatprep.subr.bf16.mxu1 %v3686_v63  ;;  %v3737_v63 = vld [vmem:[%s4280_s27 + $0x348] ss:$12 sps:$4 sm:$0xff]  }
 0x15a   : > { %2562 = vmatpush1.bf16.msra.mxu0 %v3681_v0  ;;  %v3744_v0 = vld [vmem:[%s4280_s27 + $0x334] ss:$12 sps:$4 sm:$0xff]  }
 0x15b   : > { %2535 = vmatpush2.bf16.msra.mxu1 %v3684_v1  ;;  %2563 = vmatprep.subr.bf16.mxu0 %v3689_v2  ;;  %v513_v1 = vrot.slane %v4526_v30, %v512_v61  ;;  %v509_v2 = vrot.slane %v4526_v30, %v508_v62  ;;  %v3755_v61 = vld [vmem:[%s4280_s27 + $0xc8] ss:$12 sps:$4 sm:$0xff]  }
 0x15c   : > { %2536 = vmatprep.subr.bf16.mxu1 %v3692_v4 }
 0x15e   : > { %2564 = vmatpush1.bf16.msra.mxu0 %v3687_v5 }
 0x15f   : > { %2537 = vmatpush2.bf16.msra.mxu1 %v3690_v6  ;;  %2565 = vmatprep.subr.bf16.mxu0 %v3695_v8  ;;  %v3742_v6 = vld [vmem:[%s4280_s27 + $0x330] ss:$12 sps:$4 sm:$0xff]  }
 0x160   : > { %2592 = vmatprep.subr.bf16.mxu1 %v3719_v9 }
 0x162   : > { %2566 = vmatpush2.bf16.msra.mxu0 %v3693_v10  ;;  %v3749_v10 = vld [vmem:[%s4280_s27 + $0x31c] ss:$12 sps:$4 sm:$0xff]  }
 0x163   : > { %2567 = vmatprep.subr.bf16.mxu0 %v3698_v11 }
 0x166   : > { %2568 = vmatpush2.bf16.msra.mxu0 %v3696_v12 }
 0x167   : > { %2569 = vmatprep.subr.bf16.mxu0 %v3701_v13 }
 0x16a   : > { %2570 = vmatpush2.bf16.msra.mxu0 %v3699_v14 }
 0x16b   : > { %2571 = vmatprep.subr.bf16.mxu0 %v3704_v15 }
 0x16e   : > { %2572 = vmatpush2.bf16.msra.mxu0 %v3702_v16  ;;  %v3747_v16 = vld [vmem:[%s4280_s27 + $0x318] ss:$12 sps:$4 sm:$0xff]  }
 0x16f   : > { %2573 = vmatprep.subr.bf16.mxu0 %v3707_v17 }
 0x172   : > { %2574 = vmatpush2.bf16.msra.mxu0 %v3705_v18  ;;  %v3754_v18 = vld [vmem:[%s4280_s27 + $0x304] ss:$12 sps:$4 sm:$0xff]  }
 0x173   : > { %2575 = vmatprep.subr.bf16.mxu0 %v3710_v19 }
 0x176   : > { %2576 = vmatpush2.bf16.msra.mxu0 %v3708_v36 }
 0x177   : > { %2577 = vmatprep.subr.bf16.mxu0 %v3713_v20 }
 0x17a   : > { %2578 = vmatpush2.bf16.msra.mxu0 %v3711_v21 }
 0x17b   : > { %2579 = vmatprep.subr.bf16.mxu0 %v3716_v22 }
 0x17e   : > { %2580 = vmatpush2.bf16.msra.mxu0 %v3714_v23 }
 0x17f   : > { %3242 = vmatprep.subr.bf16.mxu0 %v3720_v24  ;;  %v3752_v24 = vld [vmem:[%s4280_s27 + $0x300] ss:$12 sps:$4 sm:$0xff]  }
 0x182   : > { %v1341_v28 = vpop.f32.mrf.mxu1 }
 0x184   : > { %v1343_v32 = vpop.f32.mrf.mxu1 }
 0x186   : > { %v1345_v38 = vpop.f32.mrf.mxu1 }
 0x188   : > { %v1347_v46 = vpop.f32.mrf.mxu1 }
 0x1a1   : > { %v1298_v34 = vpop.f32.mrf.mxu0 }
 0x1a2   : > { %v1299_v39 = vadd.f32 %v1298_v34, %v501_v33 }
 0x1a3   : > { %v1300_v35 = vpop.f32.mrf.mxu0 }
 0x1a4   : > { %v1301_v37 = vadd.f32 %v1300_v35, %v505_v31  ;;  %v1342_v47 = vadd.f32 %v1341_v28, %v1299_v39  ;;  %v3759_v28 = vld [vmem:[%s4280_s27 + $0x46c] ss:$12 sps:$4 sm:$0xff]   ;;  %v3721_v35 = vld [vmem:[%s4280_s27 + $0xb0] ss:$12 sps:$4 sm:$0xff]   ;;  %v3757_v39 = vld [vmem:[%s4280_s27 + $0x468] ss:$12 sps:$4 sm:$0xff]  }
 0x1a5   : > { %v1302_v40 = vpop.f32.mrf.mxu0 }
 0x1a6   : > { %v1303_v41 = vadd.f32 %v1302_v40, %v501_v33  ;;  %v1344_v43 = vadd.f32 %v1343_v32, %v1301_v37  ;;  %v1522_v53 = vmax.f32 %v1342_v47, 0.0  ;;  %v3764_v40 = vld [vmem:[%s4280_s27 + $0x454] ss:$12 sps:$4 sm:$0xff]   ;;  %v3767_v47 = vld [vmem:[%s4280_s27 + $0x438] ss:$12 sps:$4 sm:$0xff]  }
 0x1a7   : > { %v1304_v42 = vpop.f32.mrf.mxu0 }
 0x1a8   : > { %v1346_v44 = vadd.f32 %v1345_v38, %v1303_v41  ;;  %v1305_v45 = vadd.f32 %v1304_v42, %v505_v31  ;;  %v1523_v50 = vmax.f32 %v1344_v43, 0.0  ;;  %v3725_v38 = vld [vmem:[%s4280_s27 + $0x158] ss:$12 sps:$4 sm:$0xff]   ;;  %v3730_v42 = vld [vmem:[%s4280_s27 + $0x140] ss:$12 sps:$4 sm:$0xff]  }
 0x1a9   : > { %v3726_v41 = vld [vmem:[%s4280_s27 + $0x98] ss:$12 sps:$4 sm:$0xff]   ;;  %v3762_v43 = vld [vmem:[%s4280_s27 + $0x450] ss:$12 sps:$4 sm:$0xff]  }
 0x1aa   : > { %v1348_v48 = vadd.f32 %v1347_v46, %v1305_v45  ;;  %v1528_v49 = vmax.f32 %v1346_v44, 0.0  ;;  %v3769_v44 = vld [vmem:[%s4280_s27 + $0x43c] ss:$12 sps:$4 sm:$0xff]   ;;  %v3731_v45 = vld [vmem:[%s4280_s27 + $0x80] ss:$12 sps:$4 sm:$0xff]  }
 0x1ab   : > { %v3735_v46 = vld [vmem:[%s4280_s27 + $0x128] ss:$12 sps:$4 sm:$0xff]  }
 0x1ac   : > { %v1529_v51 = vmax.f32 %v1348_v48, 0.0  ;;  %v4537_v55 = vpack.c.bf16 %v1528_v49, %v1522_v53  ;;  %v3774_v48 = vld [vmem:[%s4280_s27 + $0x424] ss:$12 sps:$4 sm:$0xff]   ;;  %v3736_v49 = vld [vmem:[%s4280_s27 + $0x68] ss:$12 sps:$4 sm:$0xff]  }
 0x1ad   : > { %v3779_v53 = vld [vmem:[%s4280_s27 + $0x40c] ss:$12 sps:$4 sm:$0xff]  }
 0x1ae   : > { %v4534_v7 = vpack.c.bf16 %v1529_v51, %v1523_v50  ;;  %v3740_v50 = vld [vmem:[%s4280_s27 + $0x110] ss:$12 sps:$4 sm:$0xff]   ;;  %v3772_v51 = vld [vmem:[%s4280_s27 + $0x420] ss:$12 sps:$4 sm:$0xff]  }
 0x1b0   : > { %2538 = vmatprep.mubr.bf16.mxu1 %v4534_v7 }
 0x1b1   : > { %2539 = vmatmul.mubr.bf16.vlgmr.msra.gmra.mxu1 %v4537_v55 }
 0x1b2   : > { %2593 = vmatpush1.bf16.msra.mxu1 %v3717_v54  ;;  %v3745_v54 = vld [vmem:[%s4280_s27 + $0xf8] ss:$12 sps:$4 sm:$0xff]  }
 0x1b3   : > { %2594 = vmatprep.subr.bf16.mxu1 %v3724_v3  ;;  %v3777_v3 = vld [vmem:[%s4280_s27 + $0x408] ss:$12 sps:$4 sm:$0xff]  }
 0x1b6   : > { %2595 = vmatpush1.bf16.msra.mxu1 %v3722_v52  ;;  %v3784_v52 = vld [vmem:[%s4280_s27 + $0x3f4] ss:$12 sps:$4 sm:$0xff]  }
 0x1b7   : > { %2596 = vmatprep.subr.bf16.mxu1 %v3729_v56  ;;  %v3746_v56 = vld [vmem:[%s4280_s27 + $0x38] ss:$12 sps:$4 sm:$0xff]  }
 0x1ba   : > { %2597 = vmatpush1.bf16.msra.mxu1 %v3727_v57  ;;  %v3750_v57 = vld [vmem:[%s4280_s27 + $0xe0] ss:$12 sps:$4 sm:$0xff]  }
 0x1bb   : > { %2598 = vmatprep.subr.bf16.mxu1 %v3734_v58  ;;  %v3782_v58 = vld [vmem:[%s4280_s27 + $0x3f0] ss:$12 sps:$4 sm:$0xff]  }
 0x1be   : > { %2599 = vmatpush1.bf16.msra.mxu1 %v3732_v59  ;;  %v3789_v59 = vld [vmem:[%s4280_s27 + $0x3dc] ss:$12 sps:$4 sm:$0xff]  }
 0x1bf   : > { %2600 = vmatprep.subr.bf16.mxu1 %v3739_v60  ;;  %v3751_v60 = vld [vmem:[%s4280_s27 + $0x20] ss:$12 sps:$4 sm:$0xff]  }
 0x1c1   : > { %v1427_v5 = vpop.f32.mrf.mxu0 }
 0x1c2   : > { %v1384_v4 = vpop.f32.mrf.mxu1  ;;  %2601 = vmatpush1.bf16.msra.mxu1 %v3737_v63  ;;  %v3787_v63 = vld [vmem:[%s4280_s27 + $0x3d8] ss:$12 sps:$4 sm:$0xff]  }
 0x1c3   : > { %v1429_v9 = vpop.f32.mrf.mxu0  ;;  %2602 = vmatprep.subr.bf16.mxu1 %v3744_v0  ;;  %v1385_v12 = vadd.f32 %v1384_v4, %v509_v2  ;;  %v3794_v0 = vld [vmem:[%s4280_s27 + $0x3c4] ss:$12 sps:$4 sm:$0xff]   ;;  %v3792_v4 = vld [vmem:[%s4280_s27 + $0x3c0] ss:$12 sps:$4 sm:$0xff]  }
 0x1c4   : > { %v1386_v8 = vpop.f32.mrf.mxu1 }
 0x1c5   : > { %v1387_v11 = vadd.f32 %v1386_v8, %v513_v1  ;;  %v1431_v14 = vpop.f32.mrf.mxu0  ;;  %v1428_v21 = vadd.f32 %v1427_v5, %v1385_v12  ;;  %v3797_v5 = vld [vmem:[%s4280_s27 + $0x470] ss:$12 sps:$4 sm:$0xff]   ;;  %v3765_v8 = vld [vmem:[%s4280_s27 + $0x2d8] ss:$12 sps:$4 sm:$0xff]   ;;  %v3775_v12 = vld [vmem:[%s4280_s27 + $0x2a8] ss:$12 sps:$4 sm:$0xff]  }
 0x1c6   : > { %v1388_v13 = vpop.f32.mrf.mxu1  ;;  %2603 = vmatpush1.bf16.msra.mxu1 %v3742_v6  ;;  %v3761_v6 = vld [vmem:[%s4280_s27 + $0x230] ss:$12 sps:$4 sm:$0xff]  }
 0x1c7   : > { %v1389_v15 = vadd.f32 %v1388_v13, %v509_v2  ;;  %2604 = vmatprep.subr.bf16.mxu1 %v3749_v10  ;;  %v1430_v19 = vadd.f32 %v1429_v9, %v1387_v11  ;;  %v1433_v22 = vpop.f32.mrf.mxu0  ;;  %v1524_v33 = vmax.f32 %v1428_v21, 0.0  ;;  %v3760_v2 = vld [vmem:[%s4280_s27 + $0x2f0] ss:$12 sps:$4 sm:$0xff]   ;;  %v3766_v9 = vld [vmem:[%s4280_s27 + $0x218] ss:$12 sps:$4 sm:$0xff]  }
 0x1c8   : > { %v1390_v17 = vpop.f32.mrf.mxu1  ;;  %v3770_v10 = vld [vmem:[%s4280_s27 + $0x2c0] ss:$12 sps:$4 sm:$0xff]   ;;  %v3776_v13 = vld [vmem:[%s4280_s27 + $0x1e8] ss:$12 sps:$4 sm:$0xff]  }
 0x1c9   : > { %v1432_v36 = vadd.f32 %v1431_v14, %v1389_v15  ;;  %v1391_v20 = vadd.f32 %v1390_v17, %v513_v1  ;;  %v1525_v31 = vmax.f32 %v1430_v19, 0.0  ;;  %v3756_v1 = vld [vmem:[%s4280_s27 + $0x8] ss:$12 sps:$4 sm:$0xff]   ;;  %v3771_v11 = vld [vmem:[%s4280_s27 + $0x200] ss:$12 sps:$4 sm:$0xff]  }
 0x1ca   : > { %2605 = vmatpush1.bf16.msra.mxu1 %v3747_v16  ;;  %v3780_v14 = vld [vmem:[%s4280_s27 + $0x290] ss:$12 sps:$4 sm:$0xff]   ;;  %v516_v16 = vsub.s32 4, %v4520_v26 }
 0x1cb   : > { %v1434_v23 = vadd.f32 %v1433_v22, %v1391_v20  ;;  %v1530_v25 = vmax.f32 %v1432_v36, 0.0  ;;  %2606 = vmatprep.subr.bf16.mxu1 %v3754_v18  ;;  %v3781_v17 = vld [vmem:[%s4280_s27 + $0x1d0] ss:$12 sps:$4 sm:$0xff]   ;;  %v3785_v18 = vld [vmem:[%s4280_s27 + $0x278] ss:$12 sps:$4 sm:$0xff]  }
 0x1cc   : > { %v517_v20 = vrot.slane %v4526_v30, %v516_v16  ;;  %v3786_v22 = vld [vmem:[%s4280_s27 + $0x1b8] ss:$12 sps:$4 sm:$0xff]  }
 0x1cd   : > { %v1531_v32 = vmax.f32 %v1434_v23, 0.0  ;;  %v4565_v37 = vpack.c.bf16 %v1530_v25, %v1524_v33 }
 0x1ce   : > { %2607 = vmatpush1.bf16.msra.mxu1 %v3752_v24  ;;  %v3790_v24 = vld [vmem:[%s4280_s27 + $0x260] ss:$12 sps:$4 sm:$0xff]  }
 0x1cf   : > { %v4562_v34 = vpack.c.bf16 %v1531_v32, %v1525_v31  ;;  %2608 = vmatprep.subr.bf16.mxu1 %v3759_v28 }
 0x1d1   : > { %2581 = vmatprep.mubr.bf16.mxu0 %v4562_v34 }
 0x1d2   : > { %2582 = vmatmul.mubr.bf16.vlgmr.msra.gmra.mxu0 %v4565_v37  ;;  %2609 = vmatpush2.bf16.msra.mxu1 %v3757_v39 }
 0x1d3   : > { %3243 = vmatpush3.bf16.msra.mxu0 %v3721_v35  ;;  %2667 = vmatprep.mubr.bf16.mxu0 %v4534_v7  ;;  %v3741_v7 = vld [vmem:[%s4280_s27 + $0x50] ss:$12 sps:$4 sm:$0xff]  }
 0x1d4   : > { %3244 = vmatprep.subr.bf16.mxu0 %v3725_v38  ;;  %2610 = vmatprep.subr.bf16.mxu1 %v3764_v40  ;;  %v3795_v38 = vld [vmem:[%s4280_s27 + $0x248] ss:$12 sps:$4 sm:$0xff]  }
 0x1d6   : > { %2611 = vmatpush2.bf16.msra.mxu1 %v3762_v43 }
 0x1d7   : > { %3245 = vmatpush3.bf16.msra.mxu0 %v3726_v41  ;;  %2612 = vmatprep.subr.bf16.mxu1 %v3769_v44  ;;  %v3796_v44 = vld [vmem:[%s4280_s27 + $0x188] ss:$12 sps:$4 sm:$0xff]  }
 0x1d8   : > { %3246 = vmatprep.subr.bf16.mxu0 %v3730_v42 }
 0x1da   : > { %2613 = vmatpush2.bf16.msra.mxu1 %v3767_v47 }
 0x1db   : > { %3247 = vmatpush3.bf16.msra.mxu0 %v3731_v45  ;;  %2614 = vmatprep.subr.bf16.mxu1 %v3774_v48 }
 0x1dc   : > { %3248 = vmatprep.subr.bf16.mxu0 %v3735_v46 }
 0x1de   : > { %2615 = vmatpush2.bf16.msra.mxu1 %v3772_v51 }
 0x1df   : > { %3249 = vmatpush3.bf16.msra.mxu0 %v3736_v49  ;;  %2616 = vmatprep.subr.bf16.mxu1 %v3779_v53  ;;  %v3799_v53 = vld [vmem:[%s4280_s27 + $0x458] ss:$12 sps:$4 sm:$0xff]  }
 0x1e0   : > { %3250 = vmatprep.subr.bf16.mxu0 %v3740_v50  ;;  %v3798_v50 = vld [vmem:[%s4280_s27 + $0x3b0] ss:$12 sps:$4 sm:$0xff]  }
 0x1e2   : > { %2617 = vmatpush2.bf16.msra.mxu1 %v3777_v3  ;;  %v1513_v15 = vpop.f32.mrf.mxu1  ;;  %v3802_v3 = vld [vmem:[%s4280_s27 + $0x380] ss:$12 sps:$4 sm:$0xff]  }
 0x1e3   : > { %3251 = vmatpush3.bf16.msra.mxu0 %v3741_v7  ;;  %2618 = vmatprep.subr.bf16.mxu1 %v3784_v52  ;;  %v3800_v7 = vld [vmem:[%s4280_s27 + $0x398] ss:$12 sps:$4 sm:$0xff]   ;;  %v3803_v52 = vld [vmem:[%s4280_s27 + $0x428] ss:$12 sps:$4 sm:$0xff]  }
 0x1e4   : > { %3252 = vmatprep.subr.bf16.mxu0 %v3745_v54  ;;  %v1515_v36 = vpop.f32.mrf.mxu1  ;;  %v3801_v54 = vld [vmem:[%s4280_s27 + $0x440] ss:$12 sps:$4 sm:$0xff]  }
 0x1e6   : > { %2619 = vmatpush2.bf16.msra.mxu1 %v3782_v58  ;;  %v1517_v31 = vpop.f32.mrf.mxu1  ;;  %v3807_v58 = vld [vmem:[%s4280_s27 + $0x3f8] ss:$12 sps:$4 sm:$0xff]  }
 0x1e7   : > { %3253 = vmatpush3.bf16.msra.mxu0 %v3746_v56  ;;  %2620 = vmatprep.subr.bf16.mxu1 %v3789_v59  ;;  %v3804_v56 = vld [vmem:[%s4280_s27 + $0x368] ss:$12 sps:$4 sm:$0xff]   ;;  %v3808_v59 = vld [vmem:[%s4280_s27 + $0x338] ss:$12 sps:$4 sm:$0xff]  }
 0x1e8   : > { %3254 = vmatprep.subr.bf16.mxu0 %v3750_v57  ;;  %v1519_v42 = vpop.f32.mrf.mxu1  ;;  %v3806_v57 = vld [vmem:[%s4280_s27 + $0x350] ss:$12 sps:$4 sm:$0xff]  }
 0x1ea   : > { %2621 = vmatpush2.bf16.msra.mxu1 %v3787_v63  ;;  %v3811_v63 = vld [vmem:[%s4280_s27 + $0x3c8] ss:$12 sps:$4 sm:$0xff]  }
 0x1eb   : > { %3255 = vmatpush3.bf16.msra.mxu0 %v3751_v60  ;;  %2622 = vmatprep.subr.bf16.mxu1 %v3794_v0  ;;  %v3809_v60 = vld [vmem:[%s4280_s27 + $0x3e0] ss:$12 sps:$4 sm:$0xff]   ;;  %v3812_v0 = vld [vmem:[%s4280_s27 + $0x308] ss:$12 sps:$4 sm:$0xff]  }
 0x1ec   : > { %3256 = vmatprep.subr.bf16.mxu0 %v3755_v61  ;;  %v3810_v61 = vld [vmem:[%s4280_s27 + $0x320] ss:$12 sps:$4 sm:$0xff]  }
 0x1ee   : > { %2623 = vmatpush2.bf16.msra.mxu1 %v3792_v4 }
 0x1ef   : > { %3257 = vmatpush3.bf16.msra.mxu0 %v3756_v1  ;;  %3286 = vmatprep.subr.bf16.mxu1 %v3797_v5 }
 0x1f0   : > { %3264 = vmatprep.subr.bf16.mxu0 %v3760_v2 }
 0x1f2   : > { %2668 = vmatmul.mubr.bf16.vlgmr.msra.gmra.mxu0 %v4537_v55  ;;  %v520_v55 = vsub.s32 5, %v4520_v26 }
 0x1f3   : > { %3265 = vmatpush3.bf16.msra.mxu0 %v3761_v6  ;;  %2708 = vmatprep.mubr.bf16.mxu0 %v4562_v34  ;;  %v3791_v34 = vld [vmem:[%s4280_s27 + $0x1a0] ss:$12 sps:$4 sm:$0xff]  }
 0x1f4   : > { %3266 = vmatprep.subr.bf16.mxu0 %v3765_v8  ;;  %v521_v19 = vrot.slane %v4526_v30, %v520_v55 }
 0x1f7   : > { %3267 = vmatpush3.bf16.msra.mxu0 %v3766_v9 }
 0x1f8   : > { %3268 = vmatprep.subr.bf16.mxu0 %v3770_v10 }
 0x1fb   : > { %3269 = vmatpush3.bf16.msra.mxu0 %v3771_v11  ;;  %v1534_v11 = vld [vmem:[#allocation2 + $0x28] sm:$0xff] }
 0x1fc   : > { %3270 = vmatprep.subr.bf16.mxu0 %v3775_v12 }
 0x1ff   : > { %3271 = vmatpush3.bf16.msra.mxu0 %v3776_v13 }
 0x200   : > { %3272 = vmatprep.subr.bf16.mxu0 %v3780_v14 }
 0x201   : > { %v1470_v21 = vpop.f32.mrf.mxu0 }
 0x202   : > { %v1471_v28 = vadd.f32 %v1470_v21, %v517_v20 }
 0x203   : > { %3273 = vmatpush3.bf16.msra.mxu0 %v3781_v17  ;;  %v1472_v23 = vpop.f32.mrf.mxu0 }
 0x204   : > { %3274 = vmatprep.subr.bf16.mxu0 %v3785_v18  ;;  %v1473_v25 = vadd.f32 %v1472_v23, %v521_v19  ;;  %v1514_v41 = vadd.f32 %v1513_v15, %v1471_v28  ;;  %v1535_v15 = vld [vmem:[#allocation2 + $0x10] sm:$0xff] }
 0x205   : > { %v1474_v32 = vpop.f32.mrf.mxu0 }
 0x206   : > { %v1475_v33 = vadd.f32 %v1474_v32, %v517_v20  ;;  %v1516_v30 = vadd.f32 %v1515_v36, %v1473_v25  ;;  %v1526_v48 = vmax.f32 %v1514_v41, 0.0  ;;  %v1537_v36 = vld [vmem:[#allocation2] sm:$0xff]  ;;  %v1538_v25 = vld [vmem:[#allocation2 + $0x18] sm:$0xff] }
 0x207   : > { %3275 = vmatpush3.bf16.msra.mxu0 %v3786_v22  ;;  %v1476_v35 = vpop.f32.mrf.mxu0 }
 0x208   : > { %3276 = vmatprep.subr.bf16.mxu0 %v3790_v24  ;;  %v1518_v39 = vadd.f32 %v1517_v31, %v1475_v33  ;;  %v1477_v40 = vadd.f32 %v1476_v35, %v521_v19  ;;  %v1527_v46 = vmax.f32 %v1516_v30, 0.0 }
 0x20a   : > { %v1520_v43 = vadd.f32 %v1519_v42, %v1477_v40  ;;  %v1532_v45 = vmax.f32 %v1518_v39, 0.0 }
 0x20b   : > { %3277 = vmatpush3.bf16.msra.mxu0 %v3791_v34 }
 0x20c   : > { %3278 = vmatprep.subr.bf16.mxu0 %v3795_v38  ;;  %v1533_v47 = vmax.f32 %v1520_v43, 0.0  ;;  %v1544_v51 = vpack.c.bf16 %v1532_v45, %v1526_v48 }
 0x20e   : > { %v1545_v49 = vpack.c.bf16 %v1533_v47, %v1527_v46 }
 0x20f   : > { %3279 = vmatpush3.bf16.msra.mxu0 %v3796_v44 }
 0x210   : > { %2624 = vmatprep.mubr.bf16.mxu1 %v1545_v49 }
 0x211   : > { %2625 = vmatmul.mubr.bf16.vlgmr.msra.gmra.mxu1 %v1544_v51 }
 0x212   : > { %2709 = vmatmul.mubr.bf16.vlgmr.msra.gmra.mxu0 %v4565_v37  ;;  %3287 = vmatpush3.bf16.msra.mxu1 %v3798_v50  ;;  %v3805_v37 = vld [vmem:[%s4280_s27 + $0x410] ss:$12 sps:$4 sm:$0xff]  }
 0x213   : > { %2749 = vmatprep.mubr.bf16.mxu1 %v1545_v49  ;;  %3288 = vmatprep.subr.bf16.mxu1 %v3799_v53  ;;  %v1536_v49 = vld [vmem:[#allocation2 + $0x8] sm:$0xff] }
 0x216   : > { %3289 = vmatpush3.bf16.msra.mxu1 %v3800_v7 }
 0x217   : > { %3290 = vmatprep.subr.bf16.mxu1 %v3801_v54 }
 0x21a   : > { %3291 = vmatpush3.bf16.msra.mxu1 %v3802_v3 }
 0x21b   : > { %3292 = vmatprep.subr.bf16.mxu1 %v3803_v52 }
 0x21e   : > { %3293 = vmatpush3.bf16.msra.mxu1 %v3804_v56  ;;  %v1539_v56 = vld [vmem:[#allocation2 + $0x20] sm:$0xff] }
 0x21f   : > { %3294 = vmatprep.subr.bf16.mxu1 %v3805_v37 }
 0x222   : > { %3295 = vmatpush3.bf16.msra.mxu1 %v3806_v57 }
 0x223   : > { %3296 = vmatprep.subr.bf16.mxu1 %v3807_v58 }
 0x226   : > { %3297 = vmatpush3.bf16.msra.mxu1 %v3808_v59 }
 0x227   : > { %3298 = vmatprep.subr.bf16.mxu1 %v3809_v60 }
 0x22a   : > { %3299 = vmatpush3.bf16.msra.mxu1 %v3810_v61 }
 0x22b   : > { %3300 = vmatprep.subr.bf16.mxu1 %v3811_v63 }
 0x22e   : > { %3301 = vmatpush3.bf16.msra.mxu1 %v3812_v0 }
 0x231   : > { %2750 = vmatmul.mubr.bf16.vlgmr.msra.gmra.mxu1 %v1544_v51 }
 0x271   : > { %v2540_v1 = vpop.f32.mrf.mxu1 }
 0x273   : > { %v2542_v2 = vpop.f32.mrf.mxu1 }
 0x275   : > { %v2544_v5 = vpop.f32.mrf.mxu1 }
 0x277   : > { %v2546_v8 = vpop.f32.mrf.mxu1 }
 0x292   : > { %v2583_v4 = vpop.f32.mrf.mxu0 }
 0x293   : > { %v2584_v10 = vadd.f32 %v2583_v4, %v2540_v1 }
 0x294   : > { %v2585_v6 = vpop.f32.mrf.mxu0 }
 0x295   : > { %v2586_v13 = vadd.f32 %v2585_v6, %v2542_v2 }
 0x296   : > { %v2587_v9 = vpop.f32.mrf.mxu0 }
 0x297   : > { %v2588_v17 = vadd.f32 %v2587_v9, %v2544_v5 }
 0x298   : > { %v2589_v55 = vpop.f32.mrf.mxu0 }
 0x299   : > { %v2590_v21 = vadd.f32 %v2589_v55, %v2546_v8 }
 0x2b2   : > { %v3258_v24 = vpop.f32.mrf.mxu0 }
 0x2b4   : > { %v3259_v34 = vpop.f32.mrf.mxu0 }
 0x2b5   : > { %v3260_v44 = vadd.f32 %v3259_v34, %v3258_v24 }
 0x2b6   : > { %v3261_v35 = vpop.f32.mrf.mxu0 }
 0x2b8   : > { %v3262_v38 = vpop.f32.mrf.mxu0 }
 0x2b9   : > { %v3263_v51 = vadd.f32 %v3262_v38, %v3261_v35 }
 0x2d1   : > { %v2626_v12 = vpop.f32.mrf.mxu1 }
 0x2d2   : > { %v2627_v14 = vadd.f32 %v2626_v12, %v2584_v10  ;;  %v3280_v30 = vpop.f32.mrf.mxu0 }
 0x2d3   : > { %v2628_v16 = vpop.f32.mrf.mxu1 }
 0x2d4   : > { %v2758_v18 = vadd.f32 %v2627_v14, %v1534_v11  ;;  %v2629_v19 = vadd.f32 %v2628_v16, %v2586_v13  ;;  %v3281_v39 = vpop.f32.mrf.mxu0 }
 0x2d5   : > { %v2630_v20 = vpop.f32.mrf.mxu1  ;;  %v3282_v41 = vadd.f32 %v3281_v39, %v3280_v30 }
 0x2d6   : > { %2764 = vst [vmem:[#allocation2 + $0x28] sm:$0xff] %v2758_v18  ;;  %v2759_v22 = vadd.f32 %v2629_v19, %v1535_v15  ;;  %v2631_v23 = vadd.f32 %v2630_v20, %v2588_v17  ;;  %v3283_v40 = vpop.f32.mrf.mxu0 }
 0x2d7   : > { %v2632_v28 = vpop.f32.mrf.mxu1  ;;  %v2711_v46 = vadd.f32 %v3282_v41, %v3260_v44 }
 0x2d8   : > { %2765 = vst [vmem:[#allocation2 + $0x10] sm:$0xff] %v2759_v22  ;;  %v2761_v31 = vadd.f32 %v2631_v23, %v1537_v36  ;;  %v2633_v32 = vadd.f32 %v2632_v28, %v2590_v21  ;;  %v3284_v42 = vpop.f32.mrf.mxu0 }
 0x2d9   : > { %v3285_v47 = vadd.f32 %v3284_v42, %v3283_v40 }
 0x2da   : > { %2767 = vst [vmem:[#allocation2] sm:$0xff] %v2761_v31  ;;  %v2762_v33 = vadd.f32 %v2633_v32, %v1538_v25 }
 0x2db   : > { %v2714_v54 = vadd.f32 %v3285_v47, %v3263_v51 }
 0x2dc   : > { %2768 = vst [vmem:[#allocation2 + $0x18] sm:$0xff] %v2762_v33 }
 0x2f1   : > { %v3302_v43 = vpop.f32.mrf.mxu1 }
 0x2f3   : > { %v3303_v45 = vpop.f32.mrf.mxu1 }
 0x2f4   : > { %v3304_v48 = vadd.f32 %v3303_v45, %v3302_v43 }
 0x2f5   : > { %v3305_v50 = vpop.f32.mrf.mxu1 }
 0x2f6   : > { %v2752_v53 = vadd.f32 %v3304_v48, %v2711_v46 }
 0x2f7   : > { %v3306_v7 = vpop.f32.mrf.mxu1 }
 0x2f8   : > { %v2760_v3 = vadd.f32 %v2752_v53, %v1536_v49  ;;  %v3307_v52 = vadd.f32 %v3306_v7, %v3305_v50 }
 0x2fa   : > { %2766 = vst [vmem:[#allocation2 + $0x8] sm:$0xff] %v2760_v3  ;;  %v2755_v37 = vadd.f32 %v3307_v52, %v2714_v54  ;;  %2773 = sbr.rel (%p3235_p1) target bundleno = 777 (0x309), region = 68 }
 0x2fc   : > { %v2763_v57 = vadd.f32 %v2755_v37, %v1539_v56 }
 0x2fe   : > { %2769 = vst [vmem:[#allocation2 + $0x20] sm:$0xff] %v2763_v57 }
 0x2ff   : > { %v2774_v58 = vld [vmem:[#allocation2 + $0x28] sm:$0xff]  ;;  %v2780_v59 = vld [vmem:[#allocation11] sm:$0x7]  ;;  %v2777_v2 = vld [vmem:[#allocation2] sm:$0xff] }
 0x300   : > { %v2775_v60 = vld [vmem:[#allocation2 + $0x10] sm:$0xff]  ;;  %v2785_v61 = vrot.slane %v2780_v59, %v500_v29  ;;  %v2789_v63 = vrot.slane %v2780_v59, %v504_v27  ;;  %v2793_v1 = vrot.slane %v2780_v59, %v508_v62  ;;  %v2778_v4 = vld [vmem:[#allocation2 + $0x18] sm:$0xff] }
 0x301   : > { %v2776_v0 = vld [vmem:[#allocation2 + $0x8] sm:$0xff] }
 0x302   : > { %v2797_v6 = vadd.f32 %v2785_v61, %v2774_v58  ;;  %v2798_v8 = vadd.f32 %v2789_v63, %v2775_v60  ;;  %v2799_v9 = vadd.f32 %v2793_v1, %v2776_v0  ;;  %v2800_v10 = vadd.f32 %v2785_v61, %v2777_v2 }
 0x303   : > { %v2801_v11 = vadd.f32 %v2789_v63, %v2778_v4 }
 0x304   : > { %2803 = vst [vmem:[#allocation12] sm:$0xff] %v2797_v6  ;;  %2804 = vst [vmem:[#allocation12 + $0x8] sm:$0xff] %v2798_v8 }
 0x305   : > { %v2779_v5 = vld [vmem:[#allocation2 + $0x20] sm:$0xff]  ;;  %2805 = vst [vmem:[#allocation12 + $0x10] sm:$0xff] %v2799_v9  ;;  %2806 = vst [vmem:[#allocation12 + $0x18] sm:$0xff] %v2800_v10 }
 0x306   : > { %v2802_v12 = vadd.f32 %v2793_v1, %v2779_v5  ;;  %2807 = vst [vmem:[#allocation12 + $0x20] sm:$0xff] %v2801_v11 }
 0x308   : > { %2808 = vst [vmem:[#allocation12 + $0x28] sm:$0xff] %v2802_v12 }
 0x309 PF: > { %p3355_p7 = scmp.eq.s32.totalorder %s4089_s22, 1  ;;  %s4037_s28 = smov [#allocation12]  }
 0x30a   : > { %s2815_s7 = sshll.u32 %s4037_s28, 4  ;;  %s2816_s7 = int_to_ptr.vmem [resolvable:$true] %s2815_s7 }
 0x30b   : > { %s3949_s10 = scalar_lea.vmem %s2816_s7, 768  ;;  %p3956_p2 = scmp.lt.s32.totalorder %s2816_s7, %s2816_s7 }
 0x30c   : > { %p3950_p11 = scmp.ne.s32.totalorder %s2816_s7, %s3949_s10  ;;  %p3957_p5 = scmp.lt.s32.totalorder %s3949_s10, %s3949_s10 }
 0x30e   : > { %p3951_p4 = pnand %p3950_p11, %p3355_p7  ;;  %p3958_p12 = por %p3957_p5, %p3956_p2 }
 0x310   : > { %p3952_p9 = pneg %p3951_p4 }
 0x312   : > { %p3959_p3 = pnand %p3958_p12, %p3952_p9 }
 0x314   : > { %3962 = shalt.err (!%p3959_p3)
}
 0x315   : > { %s4038_s13 = smov 384   ;;  %s4039_s12 = smov 24  }
 0x316   : > { %3329 = dma.vmem_to_hbm [thread:$0]  (%p3355_p7), %s2816_s7, 768, %s4675_s5, [#allocation5], %s4038_s13, %s4038_s13, %s4039_s12  }
 0x317   : > { %4006 = dma.done.wait (%p3355_p7), [#allocation5], 768  }
 0x318   : > { %4008 = vsyncadd (%p3355_p7), [#allocation5], 4294966528 }
 0x319 PF: > { %s4704_s4 = sld [smem:[#allocation18_spill]]  ;;  %p20_p6 = scmp.ge.s32.totalorder %s4092_s23, 4  }
 0x31a   : > { %s4705_s18 = smov %s4015_s19  ;;  %s4706_s19 = smov %s4019_s20 }
 0x31b   : > { %s4708_s21 = smov %s4092_s23  ;;  %22 = sbr.rel (!%p20_p6) target bundleno = 10 (0xa), region = 118 }
 0x31f   : > { %s4707_s20 = smov %s4704_s4 }
 0x320   :  { %2831 = vsyncpa [#allocation4], 1 }
 0x321   :  { %2833 = vsyncpa [#allocation4 + $0x1], 1 }
 0x322   :  { %2834 = vsyncpa [#allocation7], 1 }
 0x323   :  { %2836 = vsyncpa [#allocation7 + $0x1], 1 }
 0x324   :  { %2837 = vsyncpa [#allocation10], 1 }
 0x325   :  { %2839 = vsyncpa [#allocation10 + $0x1], 1 }
 0x326   :  { %2840 = vsyncpa [#allocation5], 1 }
 0x327   :  { %2842 = vsyncpa [#allocation5 + $0x1], 1 }

</bundles_post_ra>
